<compile_context>
chip_gen: v7x
topology: tpu7x:2x2x1
jax: 0.10.0
libtpu: 0.0.40
codegen_flags: <defaults>
</compile_context>

<pallas_src>
import functools

import jax
import jax.numpy as jnp
from jax.experimental import pallas as pl
from jax.experimental.pallas import tpu as pltpu

H = 16
W = 16
HW = H * W
NV = 4            # quad vertices
T = 2             # triangles
TEX = 8           # albedo texture resolution (TEX, TEX, 3)
TEX_ROWS = 8      # channel rows padded for the one-hot matmul

# per-triangle scalar block layout in SMEM (packed by the wrapper)
#   0..5  : a0,b0,c0,a1,b1,c1   edge functions  w = a*px + b*py + c
#   6     : z_gate              +1e37 for degenerate triangles (never wins depth)
#   7..9  : sz0,sz1,sz2         screen-space depth
#   10..12: iw0,iw1,iw2         1/clip_w (perspective-correct barycentrics)
#   13..18: u0,v0,u1,v1,u2,v2
#   19..27: n0xyz,n1xyz,n2xyz
PT = 28

# packed-output row layout of the single (OUT_ROWS, HW) kernel output
OUT_ROWS = 16     # 3 image | 1 alpha | 3 normal | 3 rot_normal | 1 viewcos | 2 uv | 3 pad


# --------------------------- fused Pallas kernel ---------------------------------------
def fused_kernel(scal_ref, tex_ref, out_ref, *, h, w, n_tri, tex_h, tex_w):
    """scal_ref: SMEM f32 (1, n_tri*PT + 9) per-view scalars (triangles + w2c row-major)
       tex_ref : VMEM bf16 (TEX_ROWS, tex_h*tex_w), rows 0..2 = R,G,B raw-albedo logits
       out_ref : VMEM f32 (OUT_ROWS, h*w) packed channel planes."""
    hw = h * w
    w2c_off = n_tri * PT

    def s(i):                      # scalar fetch from SMEM
        return scal_ref[0, i]

    # ---- pixel centers in NDC, lane-dense (1, hw); float-only math (no int div/mod) ----
    idx = jax.lax.broadcasted_iota(jnp.int32, (1, hw), 1).astype(jnp.float32)
    yf = jnp.floor((idx + 0.5) * (1.0 / w))
    xf = idx - yf * w
    px = (xf + 0.5) * (2.0 / w) - 1.0
    py = (yf + 0.5) * (2.0 / h) - 1.0

    best_z = jnp.full((1, hw), 1e30, jnp.float32)
    covered = jnp.zeros((1, hw), jnp.float32)
    u_out = jnp.zeros((1, hw), jnp.float32)
    v_out = jnp.zeros((1, hw), jnp.float32)
    n_out = [jnp.zeros((1, hw), jnp.float32) for _ in range(3)]

    # ---- brute-force barycentric rasterizer (static, tiny triangle list) ----
    # TODO(synk): nvdiffrast's hardware rasterizer exact pixel-center/edge rules and MSAA
    # are not reproducible on TPU; this is a software barycentric rasterizer.
    for t in range(n_tri):
        pb = t * PT
        w0 = s(pb + 0) * px + s(pb + 1) * py + s(pb + 2)
        w1 = s(pb + 3) * px + s(pb + 4) * py + s(pb + 5)
        w2 = 1.0 - w0 - w1
        inside = (w0 >= 0.0) & (w1 >= 0.0) & (w2 >= 0.0)

        z = w0 * s(pb + 7) + w1 * s(pb + 8) + w2 * s(pb + 9) + s(pb + 6)
        take = inside & (z < best_z)

        # perspective-correct barycentrics (== screen-space ones when clip-w == 1)
        bb0 = w0 * s(pb + 10)
        bb1 = w1 * s(pb + 11)
        bb2 = w2 * s(pb + 12)
        bsum = bb0 + bb1 + bb2
        inv_bs = pl.reciprocal(jnp.where(jnp.abs(bsum) > 1e-12, bsum, 1.0), approx=True)
        bb0, bb1, bb2 = bb0 * inv_bs, bb1 * inv_bs, bb2 * inv_bs

        u_t = bb0 * s(pb + 13) + bb1 * s(pb + 15) + bb2 * s(pb + 17)
        v_t = bb0 * s(pb + 14) + bb1 * s(pb + 16) + bb2 * s(pb + 18)
        n_t = [bb0 * s(pb + 19 + c) + bb1 * s(pb + 22 + c) + bb2 * s(pb + 25 + c)
               for c in range(3)]

        best_z = jnp.where(take, z, best_z)
        covered = jnp.where(take, 1.0, covered)
        u_out = jnp.where(take, u_t, u_out)
        v_out = jnp.where(take, v_t, v_out)
        n_out = [jnp.where(take, n_t[c], n_out[c]) for c in range(3)]

    # ---- bilinear wrap texture sample of raw albedo as a one-hot matmul (no gather) ----
    # TODO(synk): 'linear-mipmap-linear' (uses uv derivatives) has no clean Pallas
    # equivalent; plain bilinear wrap sampling is used instead.
    texn = tex_h * tex_w
    tx = u_out * tex_w - 0.5
    ty = v_out * tex_h - 0.5
    x0f = jnp.floor(tx)
    y0f = jnp.floor(ty)
    wx = tx - x0f
    wy = ty - y0f
    x0 = x0f.astype(jnp.int32)
    y0 = y0f.astype(jnp.int32)

    if (tex_w & (tex_w - 1)) == 0 and (tex_h & (tex_h - 1)) == 0:
        # power-of-two wrap: exact floor-mod via bitwise AND (handles negatives correctly)
        x0m = jnp.bitwise_and(x0, tex_w - 1)
        x1m = jnp.bitwise_and(x0 + 1, tex_w - 1)
        y0m = jnp.bitwise_and(y0, tex_h - 1)
        y1m = jnp.bitwise_and(y0 + 1, tex_h - 1)
    else:
        x0m = jnp.remainder(x0, tex_w)
        x1m = jnp.remainder(x0 + 1, tex_w)
        y0m = jnp.remainder(y0, tex_h)
        y1m = jnp.remainder(y0 + 1, tex_h)

    i00 = y0m * tex_w + x0m
    i01 = y0m * tex_w + x1m
    i10 = y1m * tex_w + x0m
    i11 = y1m * tex_w + x1m
    w00 = (1.0 - wx) * (1.0 - wy)
    w01 = wx * (1.0 - wy)
    w10 = (1.0 - wx) * wy
    w11 = wx * wy

    k_iota = jax.lax.broadcasted_iota(jnp.int32, (texn, hw), 0)
    # one tap live at a time: accumulate the one-hot weights
    wm = jnp.where(k_iota == i00, w00, 0.0)
    wm = wm + jnp.where(k_iota == i01, w01, 0.0)
    wm = wm + jnp.where(k_iota == i10, w10, 0.0)
    wm = wm + jnp.where(k_iota == i11, w11, 0.0)
    # bf16 x bf16 single-pass MXU matmul, f32 accumulate (texture already bf16)
    alb = jnp.dot(tex_ref[...], wm.astype(jnp.bfloat16),
                  preferred_element_type=jnp.float32)               # (TEX_ROWS, hw)

    # ---- shading / compositing -------------------------------------------------------
    # TODO(synk): ctx.antialias (nvdiffrast edge antialiasing) has no Pallas equivalent;
    # treated as identity.
    a = jnp.clip(covered, 0.0, 1.0)
    nx, ny, nz = n_out
    inv_n = jax.lax.rsqrt(jnp.maximum(nx * nx + ny * ny + nz * nz, 1e-24))   # F.normalize
    nx, ny, nz = nx * inv_n, ny * inv_n, nz * inv_n
    n_list = [nx, ny, nz]

    # rot_normal = normalize(einsum('bij,bhwj->bhwi', w2c, normal)); w2c row-major in SMEM
    r = [s(w2c_off + 3 * i + 0) * nx
         + s(w2c_off + 3 * i + 1) * ny
         + s(w2c_off + 3 * i + 2) * nz for i in range(3)]
    inv_r = jax.lax.rsqrt(jnp.maximum(r[0] * r[0] + r[1] * r[1] + r[2] * r[2], 1e-24))
    r = [ri * inv_r for ri in r]
    viewcos = jnp.abs(r[2])

    alb_sig = jax.nn.sigmoid(alb[0:3, :])      # sigmoid AFTER sampling; already in (0,1)

    # NOTE: matches the threestudio reference verbatim: rot_normal_aa is a lerp in
    # (n+1)/2 space with weight alpha, then composited AGAIN with alpha against
    # bg_normal=(0,0,1) in raw space (alpha intentionally applied twice, as in the spec).
    bg_n = (0.0, 0.0, 1.0)
    rows = [a * alb_sig + (1.0 - a)]                              # image (bg = (1,1,1))
    rows.append(a)                                                # alpha
    for c in range(3):                                            # normal
        rows.append(a * n_list[c] + (1.0 - a) * bg_n[c])
    for c in range(3):                                            # rot_normal
        rot_aa = (bg_n[c] + 1.0) * 0.5 + a * ((r[c] + 1.0) * 0.5 - (bg_n[c] + 1.0) * 0.5)
        rows.append(a * rot_aa + (1.0 - a) * bg_n[c])
    rows.append(viewcos)                                          # viewcos
    rows.append(u_out)                                            # uvs
    rows.append(v_out)
    rows.append(jnp.zeros((3, hw), jnp.float32))                  # pad to 16 sublanes

    out_ref[...] = jnp.concatenate(rows, axis=0)   # single unmasked (16, hw) store


# --------------------------------- helpers ---------------------------------------------
def _inv3x3(m):
    """Closed-form adjugate inverse of a (..., 3, 3) matrix (no LU / linalg HLO)."""
    a, b, c = m[..., 0, 0], m[..., 0, 1], m[..., 0, 2]
    d, e, f = m[..., 1, 0], m[..., 1, 1], m[..., 1, 2]
    g, h, i = m[..., 2, 0], m[..., 2, 1], m[..., 2, 2]
    c00 = e * i - f * h
    c01 = -(d * i - f * g)
    c02 = d * h - e * g
    det = a * c00 + b * c01 + c * c02
    inv_det = 1.0 / det
    row0 = jnp.stack([c00, -(b * i - c * h), b * f - c * e], axis=-1)
    row1 = jnp.stack([c01, a * i - c * g, -(a * f - c * d)], axis=-1)
    row2 = jnp.stack([c02, -(a * h - b * g), a * e - b * d], axis=-1)
    return jnp.stack([row0, row1, row2], axis=-2) * inv_det[..., None, None]


# --------------------------------- wrapper ---------------------------------------------
@functools.partial(jax.jit, static_argnums=(3, 4))
def nvdiff_rasterizer_forward(mvp_mtx, camera_positions, light_positions,
                              height, width, c2w, mesh, raw_albedo):
    assert (height, width) == (H, W)
    del camera_positions, light_positions    # accepted but unused by the reference forward
    B = mvp_mtx.shape[0]

    v = mesh["v"].astype(jnp.float32)
    f, ft, fn = mesh["f"], mesh["ft"], mesh["fn"]
    n_tri = f.shape[0]

    # vertex transform [v,1] @ mvp^T for all views (tiny; plain JAX glue)
    v_hom = jnp.concatenate([v, jnp.ones((v.shape[0], 1), jnp.float32)], axis=1)
    v_clip = jnp.einsum("vk,bjk->bvj", v_hom, mvp_mtx.astype(jnp.float32))     # (B, NV, 4)

    # ---- per-triangle raster constants precomputed here (out of the kernel) ----
    tp = v_clip[:, f]                                   # (B, T, 3, 4)
    cw = tp[..., 3]
    # TODO(synk): no near-plane clipping; clip-w <= 0 (vertices behind camera) unguarded.
    iw = 1.0 / cw
    sx = tp[..., 0] * iw
    sy = tp[..., 1] * iw
    sz = tp[..., 2] * iw
    x0, x1, x2 = sx[..., 0], sx[..., 1], sx[..., 2]
    y0, y1, y2 = sy[..., 0], sy[..., 1], sy[..., 2]
    area = (x1 - x0) * (y2 - y0) - (y1 - y0) * (x2 - x0)
    degen = jnp.abs(area) < 1e-12
    inv_area = 1.0 / jnp.where(degen, 1.0, area)        # guarded: no inf/NaN barycentrics
    a0 = (y1 - y2) * inv_area
    b0 = (x2 - x1) * inv_area
    c0 = ((y2 - y1) * x1 - (x2 - x1) * y1) * inv_area
    a1 = (y2 - y0) * inv_area
    b1 = (x0 - x2) * inv_area
    c1 = ((y0 - y2) * x2 - (x0 - x2) * y2) * inv_area
    z_gate = jnp.where(degen, 1e37, 0.0)                # degenerate tri never wins depth

    tri_uv = jnp.broadcast_to(mesh["vt"][ft].reshape(n_tri, 6)[None], (B, n_tri, 6))
    tri_nrm = jnp.broadcast_to(mesh["vn"][fn].reshape(n_tri, 9)[None], (B, n_tri, 9))
    tri_scal = jnp.concatenate(
        [jnp.stack([a0, b0, c0, a1, b1, c1, z_gate], axis=-1), sz, iw, tri_uv, tri_nrm],
        axis=-1)                                        # (B, T, PT)

    # w2c: closed-form 3x3 adjugate inverse (exactly the transpose for a pure rotation)
    w2c = _inv3x3(c2w[:, :3, :3].astype(jnp.float32))
    scal = jnp.concatenate([tri_scal.reshape(B, n_tri * PT),
                            w2c.reshape(B, 9)], axis=-1).astype(jnp.float32)   # (B, SCAL)
    scal_len = n_tri * PT + 9

    # flattened texture, channel-major, padded rows, bf16 for a single-pass MXU matmul
    th, tw_, _ = raw_albedo.shape
    texn = th * tw_
    tex_cm = raw_albedo.reshape(texn, 3).T.astype(jnp.float32)                 # (3, texn)
    tex_pad = jnp.zeros((TEX_ROWS, texn), jnp.float32).at[:3].set(tex_cm)
    tex_pad = tex_pad.astype(jnp.bfloat16)

    # TODO(synk): for large H*W, add a second "parallel" pixel-tile grid axis and set
    # pltpu.CompilerParams(vmem_limit_bytes=...) -- the (texn, tile) one-hot intermediate
    # caps tiles at ~8-16K pixels on v7x's 64 MiB VMEM. At 16x16 there is nothing to tile.
    out = pl.pallas_call(
        functools.partial(fused_kernel, h=H, w=W, n_tri=n_tri, tex_h=th, tex_w=tw_),
        out_shape=jax.ShapeDtypeStruct((B, OUT_ROWS, HW), jnp.float32),
        grid=(B,),
        in_specs=[
            pl.BlockSpec((1, scal_len), lambda b: (b, 0),
                         memory_space=pltpu.MemorySpace.SMEM),
            pl.BlockSpec((TEX_ROWS, texn), lambda b: (0, 0)),   # resident across the grid
        ],
        out_specs=pl.BlockSpec((None, OUT_ROWS, HW), lambda b: (b, 0, 0)),
        compiler_params=pltpu.CompilerParams(dimension_semantics=("parallel",)),
    )(scal, tex_pad)

    # ONE relayout covers every plane; everything below is cheap channel slices.
    packed = out[0]                                     # (16, HW); reference assumes B == 1
    planes = packed.T.reshape(H, W, OUT_ROWS)
    return {
        "image": planes[..., 0:3],
        "alpha": planes[..., 3:4],
        "normal": planes[..., 4:7],
        "rot_normal": planes[..., 7:10],
        "viewcos": planes[..., 10:11],
        "uvs": planes[..., 11:13],
        "comp_rgb_bg": jnp.array([1.0, 1.0, 1.0], jnp.float32),
    }


if __name__ == "__main__":
    key = jax.random.PRNGKey(0)
    k1, k2, k3 = jax.random.split(key, 3)

    # mesh: unit quad (2 triangles)
    v = jnp.array([[-0.5, -0.5, 0.0],
                   [0.5, -0.5, 0.0],
                   [0.5, 0.5, 0.0],
                   [-0.5, 0.5, 0.0]], jnp.float32)
    f = jnp.array([[0, 1, 2], [0, 2, 3]], jnp.int32)
    vt = jnp.array([[0.0, 0.0], [1.0, 0.0], [1.0, 1.0], [0.0, 1.0]], jnp.float32)
    vn_raw = jnp.array([[0.0, 0.0, 1.0],
                        [0.2, 0.0, 1.0],
                        [0.0, 0.2, 1.0],
                        [0.2, 0.2, 1.0]], jnp.float32)
    vn = vn_raw / jnp.linalg.norm(vn_raw, axis=-1, keepdims=True)
    mesh = {"v": v, "f": f, "vt": vt, "ft": f, "vn": vn, "fn": f}

    # raw_albedo = trunc_rev_sigmoid(albedo texture in (0,1))  (perpare_albedo semantics)
    albedo_tex = jax.random.uniform(k1, (TEX, TEX, 3), jnp.float32, 0.05, 0.95)
    eps = 1e-6
    a_c = jnp.clip(albedo_tex, eps, 1.0 - eps)
    raw_albedo = jnp.log(a_c / (1.0 - a_c))

    # camera: mvp (scale-only, clip w == 1), c2w with a y-axis rotation
    mvp_mtx = jnp.diag(jnp.array([1.5, 1.5, 1.0, 1.0], jnp.float32))[None]
    ang = 0.4
    cy, sy = jnp.cos(ang), jnp.sin(ang)
    rot_y = jnp.array([[cy, 0.0, sy], [0.0, 1.0, 0.0], [-sy, 0.0, cy]], jnp.float32)
    c2w = jnp.eye(4, dtype=jnp.float32).at[:3, :3].set(rot_y)[None]
    camera_positions = jax.random.normal(k2, (1, 3), jnp.float32)
    light_positions = jax.random.normal(k3, (1, 3), jnp.float32)

    results = nvdiff_rasterizer_forward(mvp_mtx, camera_positions, light_positions,
                                        H, W, c2w, mesh, raw_albedo)
    jax.block_until_ready(results)
    print("KERNEL_OK")
</pallas_src>

<mosaic_0001>
module attributes {stable_mosaic.version = 11 : i64} {
  func.func @fused_kernel(%arg0: i32, %arg1: memref<1x65xf32, #tpu.memory_space<smem>>, %arg2: memref<8x64xbf16, #tpu.memory_space<vmem>>, %arg3: memref<1x16x256xf32, #tpu.memory_space<vmem>>) attributes {dimension_semantics = [#tpu.dimension_semantics<parallel>], iteration_bounds = array<i64: 1>, scalar_prefetch = 0 : i64, scratch_operands = 0 : i64, tpu.core_type = #tpu.core_type<tc>, window_params = [{transform_indices = @transform_0, window_bounds = array<i64: 1, 65>}, {pipeline_mode = #tpu.pipeline_mode<synchronous>, transform_indices = @transform_1, window_bounds = array<i64: 8, 64>}, {transform_indices = @transform_2, window_bounds = array<i64: 1, 16, 256>}]} {
    %0 = tpu.iota {dimensions = array<i32: 1>} : vector<1x256xi32>
    %1 = arith.sitofp %0 : vector<1x256xi32> to vector<1x256xf32>
    %cst = arith.constant 5.000000e-01 : f32
    %2 = vector.broadcast %cst : f32 to vector<1x256xf32>
    %3 = arith.addf %1, %2 : vector<1x256xf32>
    %cst_0 = arith.constant 6.250000e-02 : f32
    %4 = vector.broadcast %cst_0 : f32 to vector<1x256xf32>
    %5 = arith.mulf %3, %4 : vector<1x256xf32>
    %6 = math.floor %5 : vector<1x256xf32>
    %cst_1 = arith.constant 1.600000e+01 : f32
    %7 = vector.broadcast %cst_1 : f32 to vector<1x256xf32>
    %8 = arith.mulf %6, %7 : vector<1x256xf32>
    %9 = arith.subf %1, %8 : vector<1x256xf32>
    %cst_2 = arith.constant 5.000000e-01 : f32
    %10 = vector.broadcast %cst_2 : f32 to vector<1x256xf32>
    %11 = arith.addf %9, %10 : vector<1x256xf32>
    %cst_3 = arith.constant 1.250000e-01 : f32
    %12 = vector.broadcast %cst_3 : f32 to vector<1x256xf32>
    %13 = arith.mulf %11, %12 : vector<1x256xf32>
    %cst_4 = arith.constant 1.000000e+00 : f32
    %14 = vector.broadcast %cst_4 : f32 to vector<1x256xf32>
    %15 = arith.subf %13, %14 : vector<1x256xf32>
    %cst_5 = arith.constant 5.000000e-01 : f32
    %16 = vector.broadcast %cst_5 : f32 to vector<1x256xf32>
    %17 = arith.addf %6, %16 : vector<1x256xf32>
    %cst_6 = arith.constant 1.250000e-01 : f32
    %18 = vector.broadcast %cst_6 : f32 to vector<1x256xf32>
    %19 = arith.mulf %17, %18 : vector<1x256xf32>
    %cst_7 = arith.constant 1.000000e+00 : f32
    %20 = vector.broadcast %cst_7 : f32 to vector<1x256xf32>
    %21 = arith.subf %19, %20 : vector<1x256xf32>
    %cst_8 = arith.constant 1.000000e+30 : f32
    %22 = vector.broadcast %cst_8 : f32 to vector<1x256xf32>
    %cst_9 = arith.constant 0.000000e+00 : f32
    %23 = vector.broadcast %cst_9 : f32 to vector<1x256xf32>
    %cst_10 = arith.constant 0.000000e+00 : f32
    %24 = vector.broadcast %cst_10 : f32 to vector<1x256xf32>
    %cst_11 = arith.constant 0.000000e+00 : f32
    %25 = vector.broadcast %cst_11 : f32 to vector<1x256xf32>
    %cst_12 = arith.constant 0.000000e+00 : f32
    %26 = vector.broadcast %cst_12 : f32 to vector<1x256xf32>
    %cst_13 = arith.constant 0.000000e+00 : f32
    %27 = vector.broadcast %cst_13 : f32 to vector<1x256xf32>
    %cst_14 = arith.constant 0.000000e+00 : f32
    %28 = vector.broadcast %cst_14 : f32 to vector<1x256xf32>
    %c0 = arith.constant 0 : index
    %c0_15 = arith.constant 0 : index
    %29 = memref.load %arg1[%c0, %c0_15] : memref<1x65xf32, #tpu.memory_space<smem>>
    %30 = vector.broadcast %29 : f32 to vector<1x256xf32>
    %31 = arith.mulf %30, %15 : vector<1x256xf32>
    %c0_16 = arith.constant 0 : index
    %c1 = arith.constant 1 : index
    %32 = memref.load %arg1[%c0_16, %c1] : memref<1x65xf32, #tpu.memory_space<smem>>
    %33 = vector.broadcast %32 : f32 to vector<1x256xf32>
    %34 = arith.mulf %33, %21 : vector<1x256xf32>
    %35 = arith.addf %31, %34 : vector<1x256xf32>
    %c0_17 = arith.constant 0 : index
    %c2 = arith.constant 2 : index
    %36 = memref.load %arg1[%c0_17, %c2] : memref<1x65xf32, #tpu.memory_space<smem>>
    %37 = vector.broadcast %36 : f32 to vector<1x256xf32>
    %38 = arith.addf %35, %37 : vector<1x256xf32>
    %c0_18 = arith.constant 0 : index
    %c3 = arith.constant 3 : index
    %39 = memref.load %arg1[%c0_18, %c3] : memref<1x65xf32, #tpu.memory_space<smem>>
    %40 = vector.broadcast %39 : f32 to vector<1x256xf32>
    %41 = arith.mulf %40, %15 : vector<1x256xf32>
    %c0_19 = arith.constant 0 : index
    %c4 = arith.constant 4 : index
    %42 = memref.load %arg1[%c0_19, %c4] : memref<1x65xf32, #tpu.memory_space<smem>>
    %43 = vector.broadcast %42 : f32 to vector<1x256xf32>
    %44 = arith.mulf %43, %21 : vector<1x256xf32>
    %45 = arith.addf %41, %44 : vector<1x256xf32>
    %c0_20 = arith.constant 0 : index
    %c5 = arith.constant 5 : index
    %46 = memref.load %arg1[%c0_20, %c5] : memref<1x65xf32, #tpu.memory_space<smem>>
    %47 = vector.broadcast %46 : f32 to vector<1x256xf32>
    %48 = arith.addf %45, %47 : vector<1x256xf32>
    %cst_21 = arith.constant 1.000000e+00 : f32
    %49 = vector.broadcast %cst_21 : f32 to vector<1x256xf32>
    %50 = arith.subf %49, %38 : vector<1x256xf32>
    %51 = arith.subf %50, %48 : vector<1x256xf32>
    %cst_22 = arith.constant 0.000000e+00 : f32
    %52 = vector.broadcast %cst_22 : f32 to vector<1x256xf32>
    %53 = arith.cmpf oge, %38, %52 : vector<1x256xf32>
    %cst_23 = arith.constant 0.000000e+00 : f32
    %54 = vector.broadcast %cst_23 : f32 to vector<1x256xf32>
    %55 = arith.cmpf oge, %48, %54 : vector<1x256xf32>
    %56 = arith.andi %53, %55 : vector<1x256xi1>
    %cst_24 = arith.constant 0.000000e+00 : f32
    %57 = vector.broadcast %cst_24 : f32 to vector<1x256xf32>
    %58 = arith.cmpf oge, %51, %57 : vector<1x256xf32>
    %59 = arith.andi %56, %58 : vector<1x256xi1>
    %c0_25 = arith.constant 0 : index
    %c7 = arith.constant 7 : index
    %60 = memref.load %arg1[%c0_25, %c7] : memref<1x65xf32, #tpu.memory_space<smem>>
    %61 = vector.broadcast %60 : f32 to vector<1x256xf32>
    %62 = arith.mulf %38, %61 : vector<1x256xf32>
    %c0_26 = arith.constant 0 : index
    %c8 = arith.constant 8 : index
    %63 = memref.load %arg1[%c0_26, %c8] : memref<1x65xf32, #tpu.memory_space<smem>>
    %64 = vector.broadcast %63 : f32 to vector<1x256xf32>
    %65 = arith.mulf %48, %64 : vector<1x256xf32>
    %66 = arith.addf %62, %65 : vector<1x256xf32>
    %c0_27 = arith.constant 0 : index
    %c9 = arith.constant 9 : index
    %67 = memref.load %arg1[%c0_27, %c9] : memref<1x65xf32, #tpu.memory_space<smem>>
    %68 = vector.broadcast %67 : f32 to vector<1x256xf32>
    %69 = arith.mulf %51, %68 : vector<1x256xf32>
    %70 = arith.addf %66, %69 : vector<1x256xf32>
    %c0_28 = arith.constant 0 : index
    %c6 = arith.constant 6 : index
    %71 = memref.load %arg1[%c0_28, %c6] : memref<1x65xf32, #tpu.memory_space<smem>>
    %72 = vector.broadcast %71 : f32 to vector<1x256xf32>
    %73 = arith.addf %70, %72 : vector<1x256xf32>
    %74 = arith.cmpf olt, %73, %22 : vector<1x256xf32>
    %75 = arith.andi %59, %74 : vector<1x256xi1>
    %c0_29 = arith.constant 0 : index
    %c10 = arith.constant 10 : index
    %76 = memref.load %arg1[%c0_29, %c10] : memref<1x65xf32, #tpu.memory_space<smem>>
    %77 = vector.broadcast %76 : f32 to vector<1x256xf32>
    %78 = arith.mulf %38, %77 : vector<1x256xf32>
    %c0_30 = arith.constant 0 : index
    %c11 = arith.constant 11 : index
    %79 = memref.load %arg1[%c0_30, %c11] : memref<1x65xf32, #tpu.memory_space<smem>>
    %80 = vector.broadcast %79 : f32 to vector<1x256xf32>
    %81 = arith.mulf %48, %80 : vector<1x256xf32>
    %c0_31 = arith.constant 0 : index
    %c12 = arith.constant 12 : index
    %82 = memref.load %arg1[%c0_31, %c12] : memref<1x65xf32, #tpu.memory_space<smem>>
    %83 = vector.broadcast %82 : f32 to vector<1x256xf32>
    %84 = arith.mulf %51, %83 : vector<1x256xf32>
    %85 = arith.addf %78, %81 : vector<1x256xf32>
    %86 = arith.addf %85, %84 : vector<1x256xf32>
    %87 = math.absf %86 : vector<1x256xf32>
    %cst_32 = arith.constant 9.99999996E-13 : f32
    %88 = vector.broadcast %cst_32 : f32 to vector<1x256xf32>
    %89 = arith.cmpf ogt, %87, %88 : vector<1x256xf32>
    %cst_33 = arith.constant 1.000000e+00 : f32
    %90 = vector.broadcast %cst_33 : f32 to vector<1x256xf32>
    %91 = arith.select %89, %86, %90 : vector<1x256xi1>, vector<1x256xf32>
    %92 = tpu.reciprocal %91 {approx = true} : vector<1x256xf32> -> vector<1x256xf32>
    %93 = arith.mulf %78, %92 : vector<1x256xf32>
    %94 = arith.mulf %81, %92 : vector<1x256xf32>
    %95 = arith.mulf %84, %92 : vector<1x256xf32>
    %c0_34 = arith.constant 0 : index
    %c13 = arith.constant 13 : index
    %96 = memref.load %arg1[%c0_34, %c13] : memref<1x65xf32, #tpu.memory_space<smem>>
    %97 = vector.broadcast %96 : f32 to vector<1x256xf32>
    %98 = arith.mulf %93, %97 : vector<1x256xf32>
    %c0_35 = arith.constant 0 : index
    %c15 = arith.constant 15 : index
    %99 = memref.load %arg1[%c0_35, %c15] : memref<1x65xf32, #tpu.memory_space<smem>>
    %100 = vector.broadcast %99 : f32 to vector<1x256xf32>
    %101 = arith.mulf %94, %100 : vector<1x256xf32>
    %102 = arith.addf %98, %101 : vector<1x256xf32>
    %c0_36 = arith.constant 0 : index
    %c17 = arith.constant 17 : index
    %103 = memref.load %arg1[%c0_36, %c17] : memref<1x65xf32, #tpu.memory_space<smem>>
    %104 = vector.broadcast %103 : f32 to vector<1x256xf32>
    %105 = arith.mulf %95, %104 : vector<1x256xf32>
    %106 = arith.addf %102, %105 : vector<1x256xf32>
    %c0_37 = arith.constant 0 : index
    %c14 = arith.constant 14 : index
    %107 = memref.load %arg1[%c0_37, %c14] : memref<1x65xf32, #tpu.memory_space<smem>>
    %108 = vector.broadcast %107 : f32 to vector<1x256xf32>
    %109 = arith.mulf %93, %108 : vector<1x256xf32>
    %c0_38 = arith.constant 0 : index
    %c16 = arith.constant 16 : index
    %110 = memref.load %arg1[%c0_38, %c16] : memref<1x65xf32, #tpu.memory_space<smem>>
    %111 = vector.broadcast %110 : f32 to vector<1x256xf32>
    %112 = arith.mulf %94, %111 : vector<1x256xf32>
    %113 = arith.addf %109, %112 : vector<1x256xf32>
    %c0_39 = arith.constant 0 : index
    %c18 = arith.constant 18 : index
    %114 = memref.load %arg1[%c0_39, %c18] : memref<1x65xf32, #tpu.memory_space<smem>>
    %115 = vector.broadcast %114 : f32 to vector<1x256xf32>
    %116 = arith.mulf %95, %115 : vector<1x256xf32>
    %117 = arith.addf %113, %116 : vector<1x256xf32>
    %c0_40 = arith.constant 0 : index
    %c19 = arith.constant 19 : index
    %118 = memref.load %arg1[%c0_40, %c19] : memref<1x65xf32, #tpu.memory_space<smem>>
    %119 = vector.broadcast %118 : f32 to vector<1x256xf32>
    %120 = arith.mulf %93, %119 : vector<1x256xf32>
    %c0_41 = arith.constant 0 : index
    %c22 = arith.constant 22 : index
    %121 = memref.load %arg1[%c0_41, %c22] : memref<1x65xf32, #tpu.memory_space<smem>>
    %122 = vector.broadcast %121 : f32 to vector<1x256xf32>
    %123 = arith.mulf %94, %122 : vector<1x256xf32>
    %124 = arith.addf %120, %123 : vector<1x256xf32>
    %c0_42 = arith.constant 0 : index
    %c25 = arith.constant 25 : index
    %125 = memref.load %arg1[%c0_42, %c25] : memref<1x65xf32, #tpu.memory_space<smem>>
    %126 = vector.broadcast %125 : f32 to vector<1x256xf32>
    %127 = arith.mulf %95, %126 : vector<1x256xf32>
    %128 = arith.addf %124, %127 : vector<1x256xf32>
    %c0_43 = arith.constant 0 : index
    %c20 = arith.constant 20 : index
    %129 = memref.load %arg1[%c0_43, %c20] : memref<1x65xf32, #tpu.memory_space<smem>>
    %130 = vector.broadcast %129 : f32 to vector<1x256xf32>
    %131 = arith.mulf %93, %130 : vector<1x256xf32>
    %c0_44 = arith.constant 0 : index
    %c23 = arith.constant 23 : index
    %132 = memref.load %arg1[%c0_44, %c23] : memref<1x65xf32, #tpu.memory_space<smem>>
    %133 = vector.broadcast %132 : f32 to vector<1x256xf32>
    %134 = arith.mulf %94, %133 : vector<1x256xf32>
    %135 = arith.addf %131, %134 : vector<1x256xf32>
    %c0_45 = arith.constant 0 : index
    %c26 = arith.constant 26 : index
    %136 = memref.load %arg1[%c0_45, %c26] : memref<1x65xf32, #tpu.memory_space<smem>>
    %137 = vector.broadcast %136 : f32 to vector<1x256xf32>
    %138 = arith.mulf %95, %137 : vector<1x256xf32>
    %139 = arith.addf %135, %138 : vector<1x256xf32>
    %c0_46 = arith.constant 0 : index
    %c21 = arith.constant 21 : index
    %140 = memref.load %arg1[%c0_46, %c21] : memref<1x65xf32, #tpu.memory_space<smem>>
    %141 = vector.broadcast %140 : f32 to vector<1x256xf32>
    %142 = arith.mulf %93, %141 : vector<1x256xf32>
    %c0_47 = arith.constant 0 : index
    %c24 = arith.constant 24 : index
    %143 = memref.load %arg1[%c0_47, %c24] : memref<1x65xf32, #tpu.memory_space<smem>>
    %144 = vector.broadcast %143 : f32 to vector<1x256xf32>
    %145 = arith.mulf %94, %144 : vector<1x256xf32>
    %146 = arith.addf %142, %145 : vector<1x256xf32>
    %c0_48 = arith.constant 0 : index
    %c27 = arith.constant 27 : index
    %147 = memref.load %arg1[%c0_48, %c27] : memref<1x65xf32, #tpu.memory_space<smem>>
    %148 = vector.broadcast %147 : f32 to vector<1x256xf32>
    %149 = arith.mulf %95, %148 : vector<1x256xf32>
    %150 = arith.addf %146, %149 : vector<1x256xf32>
    %151 = arith.select %75, %73, %22 : vector<1x256xi1>, vector<1x256xf32>
    %cst_49 = arith.constant 1.000000e+00 : f32
    %152 = vector.broadcast %cst_49 : f32 to vector<1x256xf32>
    %153 = arith.select %75, %152, %23 : vector<1x256xi1>, vector<1x256xf32>
    %154 = arith.select %75, %106, %24 : vector<1x256xi1>, vector<1x256xf32>
    %155 = arith.select %75, %117, %25 : vector<1x256xi1>, vector<1x256xf32>
    %156 = arith.select %75, %128, %26 : vector<1x256xi1>, vector<1x256xf32>
    %157 = arith.select %75, %139, %27 : vector<1x256xi1>, vector<1x256xf32>
    %158 = arith.select %75, %150, %28 : vector<1x256xi1>, vector<1x256xf32>
    %c0_50 = arith.constant 0 : index
    %c28 = arith.constant 28 : index
    %159 = memref.load %arg1[%c0_50, %c28] : memref<1x65xf32, #tpu.memory_space<smem>>
    %160 = vector.broadcast %159 : f32 to vector<1x256xf32>
    %161 = arith.mulf %160, %15 : vector<1x256xf32>
    %c0_51 = arith.constant 0 : index
    %c29 = arith.constant 29 : index
    %162 = memref.load %arg1[%c0_51, %c29] : memref<1x65xf32, #tpu.memory_space<smem>>
    %163 = vector.broadcast %162 : f32 to vector<1x256xf32>
    %164 = arith.mulf %163, %21 : vector<1x256xf32>
    %165 = arith.addf %161, %164 : vector<1x256xf32>
    %c0_52 = arith.constant 0 : index
    %c30 = arith.constant 30 : index
    %166 = memref.load %arg1[%c0_52, %c30] : memref<1x65xf32, #tpu.memory_space<smem>>
    %167 = vector.broadcast %166 : f32 to vector<1x256xf32>
    %168 = arith.addf %165, %167 : vector<1x256xf32>
    %c0_53 = arith.constant 0 : index
    %c31 = arith.constant 31 : index
    %169 = memref.load %arg1[%c0_53, %c31] : memref<1x65xf32, #tpu.memory_space<smem>>
    %170 = vector.broadcast %169 : f32 to vector<1x256xf32>
    %171 = arith.mulf %170, %15 : vector<1x256xf32>
    %c0_54 = arith.constant 0 : index
    %c32 = arith.constant 32 : index
    %172 = memref.load %arg1[%c0_54, %c32] : memref<1x65xf32, #tpu.memory_space<smem>>
    %173 = vector.broadcast %172 : f32 to vector<1x256xf32>
    %174 = arith.mulf %173, %21 : vector<1x256xf32>
    %175 = arith.addf %171, %174 : vector<1x256xf32>
    %c0_55 = arith.constant 0 : index
    %c33 = arith.constant 33 : index
    %176 = memref.load %arg1[%c0_55, %c33] : memref<1x65xf32, #tpu.memory_space<smem>>
    %177 = vector.broadcast %176 : f32 to vector<1x256xf32>
    %178 = arith.addf %175, %177 : vector<1x256xf32>
    %cst_56 = arith.constant 1.000000e+00 : f32
    %179 = vector.broadcast %cst_56 : f32 to vector<1x256xf32>
    %180 = arith.subf %179, %168 : vector<1x256xf32>
    %181 = arith.subf %180, %178 : vector<1x256xf32>
    %cst_57 = arith.constant 0.000000e+00 : f32
    %182 = vector.broadcast %cst_57 : f32 to vector<1x256xf32>
    %183 = arith.cmpf oge, %168, %182 : vector<1x256xf32>
    %cst_58 = arith.constant 0.000000e+00 : f32
    %184 = vector.broadcast %cst_58 : f32 to vector<1x256xf32>
    %185 = arith.cmpf oge, %178, %184 : vector<1x256xf32>
    %186 = arith.andi %183, %185 : vector<1x256xi1>
    %cst_59 = arith.constant 0.000000e+00 : f32
    %187 = vector.broadcast %cst_59 : f32 to vector<1x256xf32>
    %188 = arith.cmpf oge, %181, %187 : vector<1x256xf32>
    %189 = arith.andi %186, %188 : vector<1x256xi1>
    %c0_60 = arith.constant 0 : index
    %c35 = arith.constant 35 : index
    %190 = memref.load %arg1[%c0_60, %c35] : memref<1x65xf32, #tpu.memory_space<smem>>
    %191 = vector.broadcast %190 : f32 to vector<1x256xf32>
    %192 = arith.mulf %168, %191 : vector<1x256xf32>
    %c0_61 = arith.constant 0 : index
    %c36 = arith.constant 36 : index
    %193 = memref.load %arg1[%c0_61, %c36] : memref<1x65xf32, #tpu.memory_space<smem>>
    %194 = vector.broadcast %193 : f32 to vector<1x256xf32>
    %195 = arith.mulf %178, %194 : vector<1x256xf32>
    %196 = arith.addf %192, %195 : vector<1x256xf32>
    %c0_62 = arith.constant 0 : index
    %c37 = arith.constant 37 : index
    %197 = memref.load %arg1[%c0_62, %c37] : memref<1x65xf32, #tpu.memory_space<smem>>
    %198 = vector.broadcast %197 : f32 to vector<1x256xf32>
    %199 = arith.mulf %181, %198 : vector<1x256xf32>
    %200 = arith.addf %196, %199 : vector<1x256xf32>
    %c0_63 = arith.constant 0 : index
    %c34 = arith.constant 34 : index
    %201 = memref.load %arg1[%c0_63, %c34] : memref<1x65xf32, #tpu.memory_space<smem>>
    %202 = vector.broadcast %201 : f32 to vector<1x256xf32>
    %203 = arith.addf %200, %202 : vector<1x256xf32>
    %204 = arith.cmpf olt, %203, %151 : vector<1x256xf32>
    %205 = arith.andi %189, %204 : vector<1x256xi1>
    %c0_64 = arith.constant 0 : index
    %c38 = arith.constant 38 : index
    %206 = memref.load %arg1[%c0_64, %c38] : memref<1x65xf32, #tpu.memory_space<smem>>
    %207 = vector.broadcast %206 : f32 to vector<1x256xf32>
    %208 = arith.mulf %168, %207 : vector<1x256xf32>
    %c0_65 = arith.constant 0 : index
    %c39 = arith.constant 39 : index
    %209 = memref.load %arg1[%c0_65, %c39] : memref<1x65xf32, #tpu.memory_space<smem>>
    %210 = vector.broadcast %209 : f32 to vector<1x256xf32>
    %211 = arith.mulf %178, %210 : vector<1x256xf32>
    %c0_66 = arith.constant 0 : index
    %c40 = arith.constant 40 : index
    %212 = memref.load %arg1[%c0_66, %c40] : memref<1x65xf32, #tpu.memory_space<smem>>
    %213 = vector.broadcast %212 : f32 to vector<1x256xf32>
    %214 = arith.mulf %181, %213 : vector<1x256xf32>
    %215 = arith.addf %208, %211 : vector<1x256xf32>
    %216 = arith.addf %215, %214 : vector<1x256xf32>
    %217 = math.absf %216 : vector<1x256xf32>
    %cst_67 = arith.constant 9.99999996E-13 : f32
    %218 = vector.broadcast %cst_67 : f32 to vector<1x256xf32>
    %219 = arith.cmpf ogt, %217, %218 : vector<1x256xf32>
    %cst_68 = arith.constant 1.000000e+00 : f32
    %220 = vector.broadcast %cst_68 : f32 to vector<1x256xf32>
    %221 = arith.select %219, %216, %220 : vector<1x256xi1>, vector<1x256xf32>
    %222 = tpu.reciprocal %221 {approx = true} : vector<1x256xf32> -> vector<1x256xf32>
    %223 = arith.mulf %208, %222 : vector<1x256xf32>
    %224 = arith.mulf %211, %222 : vector<1x256xf32>
    %225 = arith.mulf %214, %222 : vector<1x256xf32>
    %c0_69 = arith.constant 0 : index
    %c41 = arith.constant 41 : index
    %226 = memref.load %arg1[%c0_69, %c41] : memref<1x65xf32, #tpu.memory_space<smem>>
    %227 = vector.broadcast %226 : f32 to vector<1x256xf32>
    %228 = arith.mulf %223, %227 : vector<1x256xf32>
    %c0_70 = arith.constant 0 : index
    %c43 = arith.constant 43 : index
    %229 = memref.load %arg1[%c0_70, %c43] : memref<1x65xf32, #tpu.memory_space<smem>>
    %230 = vector.broadcast %229 : f32 to vector<1x256xf32>
    %231 = arith.mulf %224, %230 : vector<1x256xf32>
    %232 = arith.addf %228, %231 : vector<1x256xf32>
    %c0_71 = arith.constant 0 : index
    %c45 = arith.constant 45 : index
    %233 = memref.load %arg1[%c0_71, %c45] : memref<1x65xf32, #tpu.memory_space<smem>>
    %234 = vector.broadcast %233 : f32 to vector<1x256xf32>
    %235 = arith.mulf %225, %234 : vector<1x256xf32>
    %236 = arith.addf %232, %235 : vector<1x256xf32>
    %c0_72 = arith.constant 0 : index
    %c42 = arith.constant 42 : index
    %237 = memref.load %arg1[%c0_72, %c42] : memref<1x65xf32, #tpu.memory_space<smem>>
    %238 = vector.broadcast %237 : f32 to vector<1x256xf32>
    %239 = arith.mulf %223, %238 : vector<1x256xf32>
    %c0_73 = arith.constant 0 : index
    %c44 = arith.constant 44 : index
    %240 = memref.load %arg1[%c0_73, %c44] : memref<1x65xf32, #tpu.memory_space<smem>>
    %241 = vector.broadcast %240 : f32 to vector<1x256xf32>
    %242 = arith.mulf %224, %241 : vector<1x256xf32>
    %243 = arith.addf %239, %242 : vector<1x256xf32>
    %c0_74 = arith.constant 0 : index
    %c46 = arith.constant 46 : index
    %244 = memref.load %arg1[%c0_74, %c46] : memref<1x65xf32, #tpu.memory_space<smem>>
    %245 = vector.broadcast %244 : f32 to vector<1x256xf32>
    %246 = arith.mulf %225, %245 : vector<1x256xf32>
    %247 = arith.addf %243, %246 : vector<1x256xf32>
    %c0_75 = arith.constant 0 : index
    %c47 = arith.constant 47 : index
    %248 = memref.load %arg1[%c0_75, %c47] : memref<1x65xf32, #tpu.memory_space<smem>>
    %249 = vector.broadcast %248 : f32 to vector<1x256xf32>
    %250 = arith.mulf %223, %249 : vector<1x256xf32>
    %c0_76 = arith.constant 0 : index
    %c50 = arith.constant 50 : index
    %251 = memref.load %arg1[%c0_76, %c50] : memref<1x65xf32, #tpu.memory_space<smem>>
    %252 = vector.broadcast %251 : f32 to vector<1x256xf32>
    %253 = arith.mulf %224, %252 : vector<1x256xf32>
    %254 = arith.addf %250, %253 : vector<1x256xf32>
    %c0_77 = arith.constant 0 : index
    %c53 = arith.constant 53 : index
    %255 = memref.load %arg1[%c0_77, %c53] : memref<1x65xf32, #tpu.memory_space<smem>>
    %256 = vector.broadcast %255 : f32 to vector<1x256xf32>
    %257 = arith.mulf %225, %256 : vector<1x256xf32>
    %258 = arith.addf %254, %257 : vector<1x256xf32>
    %c0_78 = arith.constant 0 : index
    %c48 = arith.constant 48 : index
    %259 = memref.load %arg1[%c0_78, %c48] : memref<1x65xf32, #tpu.memory_space<smem>>
    %260 = vector.broadcast %259 : f32 to vector<1x256xf32>
    %261 = arith.mulf %223, %260 : vector<1x256xf32>
    %c0_79 = arith.constant 0 : index
    %c51 = arith.constant 51 : index
    %262 = memref.load %arg1[%c0_79, %c51] : memref<1x65xf32, #tpu.memory_space<smem>>
    %263 = vector.broadcast %262 : f32 to vector<1x256xf32>
    %264 = arith.mulf %224, %263 : vector<1x256xf32>
    %265 = arith.addf %261, %264 : vector<1x256xf32>
    %c0_80 = arith.constant 0 : index
    %c54 = arith.constant 54 : index
    %266 = memref.load %arg1[%c0_80, %c54] : memref<1x65xf32, #tpu.memory_space<smem>>
    %267 = vector.broadcast %266 : f32 to vector<1x256xf32>
    %268 = arith.mulf %225, %267 : vector<1x256xf32>
    %269 = arith.addf %265, %268 : vector<1x256xf32>
    %c0_81 = arith.constant 0 : index
    %c49 = arith.constant 49 : index
    %270 = memref.load %arg1[%c0_81, %c49] : memref<1x65xf32, #tpu.memory_space<smem>>
    %271 = vector.broadcast %270 : f32 to vector<1x256xf32>
    %272 = arith.mulf %223, %271 : vector<1x256xf32>
    %c0_82 = arith.constant 0 : index
    %c52 = arith.constant 52 : index
    %273 = memref.load %arg1[%c0_82, %c52] : memref<1x65xf32, #tpu.memory_space<smem>>
    %274 = vector.broadcast %273 : f32 to vector<1x256xf32>
    %275 = arith.mulf %224, %274 : vector<1x256xf32>
    %276 = arith.addf %272, %275 : vector<1x256xf32>
    %c0_83 = arith.constant 0 : index
    %c55 = arith.constant 55 : index
    %277 = memref.load %arg1[%c0_83, %c55] : memref<1x65xf32, #tpu.memory_space<smem>>
    %278 = vector.broadcast %277 : f32 to vector<1x256xf32>
    %279 = arith.mulf %225, %278 : vector<1x256xf32>
    %280 = arith.addf %276, %279 : vector<1x256xf32>
    %cst_84 = arith.constant 1.000000e+00 : f32
    %281 = vector.broadcast %cst_84 : f32 to vector<1x256xf32>
    %282 = arith.select %205, %281, %153 : vector<1x256xi1>, vector<1x256xf32>
    %283 = arith.select %205, %236, %154 : vector<1x256xi1>, vector<1x256xf32>
    %284 = arith.select %205, %247, %155 : vector<1x256xi1>, vector<1x256xf32>
    %285 = arith.select %205, %258, %156 : vector<1x256xi1>, vector<1x256xf32>
    %286 = arith.select %205, %269, %157 : vector<1x256xi1>, vector<1x256xf32>
    %287 = arith.select %205, %280, %158 : vector<1x256xi1>, vector<1x256xf32>
    %cst_85 = arith.constant 8.000000e+00 : f32
    %288 = vector.broadcast %cst_85 : f32 to vector<1x256xf32>
    %289 = arith.mulf %283, %288 : vector<1x256xf32>
    %cst_86 = arith.constant 5.000000e-01 : f32
    %290 = vector.broadcast %cst_86 : f32 to vector<1x256xf32>
    %291 = arith.subf %289, %290 : vector<1x256xf32>
    %cst_87 = arith.constant 8.000000e+00 : f32
    %292 = vector.broadcast %cst_87 : f32 to vector<1x256xf32>
    %293 = arith.mulf %284, %292 : vector<1x256xf32>
    %cst_88 = arith.constant 5.000000e-01 : f32
    %294 = vector.broadcast %cst_88 : f32 to vector<1x256xf32>
    %295 = arith.subf %293, %294 : vector<1x256xf32>
    %296 = math.floor %291 : vector<1x256xf32>
    %297 = math.floor %295 : vector<1x256xf32>
    %298 = arith.subf %291, %296 : vector<1x256xf32>
    %299 = arith.subf %295, %297 : vector<1x256xf32>
    %300 = arith.fptosi %296 : vector<1x256xf32> to vector<1x256xi32>
    %301 = arith.fptosi %297 : vector<1x256xf32> to vector<1x256xi32>
    %c7_i32 = arith.constant 7 : i32
    %302 = vector.broadcast %c7_i32 : i32 to vector<1x256xi32>
    %303 = arith.andi %300, %302 : vector<1x256xi32>
    %c1_i32 = arith.constant 1 : i32
    %304 = vector.broadcast %c1_i32 : i32 to vector<1x256xi32>
    %305 = arith.addi %300, %304 : vector<1x256xi32>
    %c7_i32_89 = arith.constant 7 : i32
    %306 = vector.broadcast %c7_i32_89 : i32 to vector<1x256xi32>
    %307 = arith.andi %305, %306 : vector<1x256xi32>
    %c7_i32_90 = arith.constant 7 : i32
    %308 = vector.broadcast %c7_i32_90 : i32 to vector<1x256xi32>
    %309 = arith.andi %301, %308 : vector<1x256xi32>
    %c1_i32_91 = arith.constant 1 : i32
    %310 = vector.broadcast %c1_i32_91 : i32 to vector<1x256xi32>
    %311 = arith.addi %301, %310 : vector<1x256xi32>
    %c7_i32_92 = arith.constant 7 : i32
    %312 = vector.broadcast %c7_i32_92 : i32 to vector<1x256xi32>
    %313 = arith.andi %311, %312 : vector<1x256xi32>
    %c8_i32 = arith.constant 8 : i32
    %314 = vector.broadcast %c8_i32 : i32 to vector<1x256xi32>
    %315 = arith.muli %309, %314 : vector<1x256xi32>
    %316 = arith.addi %315, %303 : vector<1x256xi32>
    %c8_i32_93 = arith.constant 8 : i32
    %317 = vector.broadcast %c8_i32_93 : i32 to vector<1x256xi32>
    %318 = arith.muli %309, %317 : vector<1x256xi32>
    %319 = arith.addi %318, %307 : vector<1x256xi32>
    %c8_i32_94 = arith.constant 8 : i32
    %320 = vector.broadcast %c8_i32_94 : i32 to vector<1x256xi32>
    %321 = arith.muli %313, %320 : vector<1x256xi32>
    %322 = arith.addi %321, %303 : vector<1x256xi32>
    %c8_i32_95 = arith.constant 8 : i32
    %323 = vector.broadcast %c8_i32_95 : i32 to vector<1x256xi32>
    %324 = arith.muli %313, %323 : vector<1x256xi32>
    %325 = arith.addi %324, %307 : vector<1x256xi32>
    %cst_96 = arith.constant 1.000000e+00 : f32
    %326 = vector.broadcast %cst_96 : f32 to vector<1x256xf32>
    %327 = arith.subf %326, %298 : vector<1x256xf32>
    %cst_97 = arith.constant 1.000000e+00 : f32
    %328 = vector.broadcast %cst_97 : f32 to vector<1x256xf32>
    %329 = arith.subf %328, %299 : vector<1x256xf32>
    %330 = arith.mulf %327, %329 : vector<1x256xf32>
    %cst_98 = arith.constant 1.000000e+00 : f32
    %331 = vector.broadcast %cst_98 : f32 to vector<1x256xf32>
    %332 = arith.subf %331, %299 : vector<1x256xf32>
    %333 = arith.mulf %298, %332 : vector<1x256xf32>
    %cst_99 = arith.constant 1.000000e+00 : f32
    %334 = vector.broadcast %cst_99 : f32 to vector<1x256xf32>
    %335 = arith.subf %334, %298 : vector<1x256xf32>
    %336 = arith.mulf %335, %299 : vector<1x256xf32>
    %337 = arith.mulf %298, %299 : vector<1x256xf32>
    %338 = tpu.iota {dimensions = array<i32: 0>} : vector<64x256xi32>
    %339 = vector.broadcast %316 : vector<1x256xi32> to vector<64x256xi32>
    %340 = arith.cmpi eq, %338, %339 : vector<64x256xi32>
    %cst_100 = arith.constant 0.000000e+00 : f32
    %341 = vector.shape_cast %330 : vector<1x256xf32> to vector<1x256xf32>
    %342 = vector.broadcast %341 : vector<1x256xf32> to vector<64x256xf32>
    %343 = vector.broadcast %cst_100 : f32 to vector<64x256xf32>
    %344 = arith.select %340, %342, %343 : vector<64x256xi1>, vector<64x256xf32>
    %345 = vector.broadcast %319 : vector<1x256xi32> to vector<64x256xi32>
    %346 = arith.cmpi eq, %338, %345 : vector<64x256xi32>
    %cst_101 = arith.constant 0.000000e+00 : f32
    %347 = vector.shape_cast %333 : vector<1x256xf32> to vector<1x256xf32>
    %348 = vector.broadcast %347 : vector<1x256xf32> to vector<64x256xf32>
    %349 = vector.broadcast %cst_101 : f32 to vector<64x256xf32>
    %350 = arith.select %346, %348, %349 : vector<64x256xi1>, vector<64x256xf32>
    %351 = arith.addf %344, %350 : vector<64x256xf32>
    %352 = vector.broadcast %322 : vector<1x256xi32> to vector<64x256xi32>
    %353 = arith.cmpi eq, %338, %352 : vector<64x256xi32>
    %cst_102 = arith.constant 0.000000e+00 : f32
    %354 = vector.shape_cast %336 : vector<1x256xf32> to vector<1x256xf32>
    %355 = vector.broadcast %354 : vector<1x256xf32> to vector<64x256xf32>
    %356 = vector.broadcast %cst_102 : f32 to vector<64x256xf32>
    %357 = arith.select %353, %355, %356 : vector<64x256xi1>, vector<64x256xf32>
    %358 = arith.addf %351, %357 : vector<64x256xf32>
    %359 = vector.broadcast %325 : vector<1x256xi32> to vector<64x256xi32>
    %360 = arith.cmpi eq, %338, %359 : vector<64x256xi32>
    %cst_103 = arith.constant 0.000000e+00 : f32
    %361 = vector.shape_cast %337 : vector<1x256xf32> to vector<1x256xf32>
    %362 = vector.broadcast %361 : vector<1x256xf32> to vector<64x256xf32>
    %363 = vector.broadcast %cst_103 : f32 to vector<64x256xf32>
    %364 = arith.select %360, %362, %363 : vector<64x256xi1>, vector<64x256xf32>
    %365 = arith.addf %358, %364 : vector<64x256xf32>
    %c0_104 = arith.constant 0 : index
    %c0_105 = arith.constant 0 : index
    %366 = vector.load %arg2[%c0_104, %c0_105] : memref<8x64xbf16, #tpu.memory_space<vmem>>, vector<8x64xbf16>
    %367 = arith.truncf %365 : vector<64x256xf32> to vector<64x256xbf16>
    %cst_106 = arith.constant dense<0.000000e+00> : vector<8x256xf32>
    %368 = tpu.matmul %366, %367, %cst_106 {dimension_numbers = #tpu.dot_dimension_numbers<[1], [0], [0], [1], [0, 0, 1, 1], [], []>} : vector<8x64xbf16>, vector<64x256xbf16>, vector<8x256xf32> -> vector<8x256xf32>
    %cst_107 = arith.constant 0.000000e+00 : f32
    %cst_108 = arith.constant 1.000000e+00 : f32
    %369 = vector.broadcast %cst_107 : f32 to vector<1x256xf32>
    %370 = arith.maximumf %369, %282 : vector<1x256xf32>
    %371 = vector.broadcast %cst_108 : f32 to vector<1x256xf32>
    %372 = arith.minimumf %371, %370 : vector<1x256xf32>
    %373 = arith.mulf %285, %285 : vector<1x256xf32>
    %374 = arith.mulf %286, %286 : vector<1x256xf32>
    %375 = arith.addf %373, %374 : vector<1x256xf32>
    %376 = arith.mulf %287, %287 : vector<1x256xf32>
    %377 = arith.addf %375, %376 : vector<1x256xf32>
    %cst_109 = arith.constant 1.000000e-24 : f32
    %378 = vector.broadcast %cst_109 : f32 to vector<1x256xf32>
    %379 = arith.maximumf %377, %378 : vector<1x256xf32>
    %380 = math.rsqrt %379 : vector<1x256xf32>
    %381 = arith.mulf %285, %380 : vector<1x256xf32>
    %382 = arith.mulf %286, %380 : vector<1x256xf32>
    %383 = arith.mulf %287, %380 : vector<1x256xf32>
    %c0_110 = arith.constant 0 : index
    %c56 = arith.constant 56 : index
    %384 = memref.load %arg1[%c0_110, %c56] : memref<1x65xf32, #tpu.memory_space<smem>>
    %385 = vector.broadcast %384 : f32 to vector<1x256xf32>
    %386 = arith.mulf %385, %381 : vector<1x256xf32>
    %c0_111 = arith.constant 0 : index
    %c57 = arith.constant 57 : index
    %387 = memref.load %arg1[%c0_111, %c57] : memref<1x65xf32, #tpu.memory_space<smem>>
    %388 = vector.broadcast %387 : f32 to vector<1x256xf32>
    %389 = arith.mulf %388, %382 : vector<1x256xf32>
    %390 = arith.addf %386, %389 : vector<1x256xf32>
    %c0_112 = arith.constant 0 : index
    %c58 = arith.constant 58 : index
    %391 = memref.load %arg1[%c0_112, %c58] : memref<1x65xf32, #tpu.memory_space<smem>>
    %392 = vector.broadcast %391 : f32 to vector<1x256xf32>
    %393 = arith.mulf %392, %383 : vector<1x256xf32>
    %394 = arith.addf %390, %393 : vector<1x256xf32>
    %c0_113 = arith.constant 0 : index
    %c59 = arith.constant 59 : index
    %395 = memref.load %arg1[%c0_113, %c59] : memref<1x65xf32, #tpu.memory_space<smem>>
    %396 = vector.broadcast %395 : f32 to vector<1x256xf32>
    %397 = arith.mulf %396, %381 : vector<1x256xf32>
    %c0_114 = arith.constant 0 : index
    %c60 = arith.constant 60 : index
    %398 = memref.load %arg1[%c0_114, %c60] : memref<1x65xf32, #tpu.memory_space<smem>>
    %399 = vector.broadcast %398 : f32 to vector<1x256xf32>
    %400 = arith.mulf %399, %382 : vector<1x256xf32>
    %401 = arith.addf %397, %400 : vector<1x256xf32>
    %c0_115 = arith.constant 0 : index
    %c61 = arith.constant 61 : index
    %402 = memref.load %arg1[%c0_115, %c61] : memref<1x65xf32, #tpu.memory_space<smem>>
    %403 = vector.broadcast %402 : f32 to vector<1x256xf32>
    %404 = arith.mulf %403, %383 : vector<1x256xf32>
    %405 = arith.addf %401, %404 : vector<1x256xf32>
    %c0_116 = arith.constant 0 : index
    %c62 = arith.constant 62 : index
    %406 = memref.load %arg1[%c0_116, %c62] : memref<1x65xf32, #tpu.memory_space<smem>>
    %407 = vector.broadcast %406 : f32 to vector<1x256xf32>
    %408 = arith.mulf %407, %381 : vector<1x256xf32>
    %c0_117 = arith.constant 0 : index
    %c63 = arith.constant 63 : index
    %409 = memref.load %arg1[%c0_117, %c63] : memref<1x65xf32, #tpu.memory_space<smem>>
    %410 = vector.broadcast %409 : f32 to vector<1x256xf32>
    %411 = arith.mulf %410, %382 : vector<1x256xf32>
    %412 = arith.addf %408, %411 : vector<1x256xf32>
    %c0_118 = arith.constant 0 : index
    %c64 = arith.constant 64 : index
    %413 = memref.load %arg1[%c0_118, %c64] : memref<1x65xf32, #tpu.memory_space<smem>>
    %414 = vector.broadcast %413 : f32 to vector<1x256xf32>
    %415 = arith.mulf %414, %383 : vector<1x256xf32>
    %416 = arith.addf %412, %415 : vector<1x256xf32>
    %417 = arith.mulf %394, %394 : vector<1x256xf32>
    %418 = arith.mulf %405, %405 : vector<1x256xf32>
    %419 = arith.addf %417, %418 : vector<1x256xf32>
    %420 = arith.mulf %416, %416 : vector<1x256xf32>
    %421 = arith.addf %419, %420 : vector<1x256xf32>
    %cst_119 = arith.constant 1.000000e-24 : f32
    %422 = vector.broadcast %cst_119 : f32 to vector<1x256xf32>
    %423 = arith.maximumf %421, %422 : vector<1x256xf32>
    %424 = math.rsqrt %423 : vector<1x256xf32>
    %425 = arith.mulf %394, %424 : vector<1x256xf32>
    %426 = arith.mulf %405, %424 : vector<1x256xf32>
    %427 = arith.mulf %416, %424 : vector<1x256xf32>
    %428 = math.absf %427 : vector<1x256xf32>
    %429 = vector.extract_strided_slice %368 {offsets = [0, 0], sizes = [3, 256], strides = [1, 1]} : vector<8x256xf32> to vector<3x256xf32>
    %430 = arith.negf %429 : vector<3x256xf32>
    %431 = math.exp %430 : vector<3x256xf32>
    %cst_120 = arith.constant 1.000000e+00 : f32
    %432 = vector.broadcast %cst_120 : f32 to vector<3x256xf32>
    %433 = arith.addf %432, %431 : vector<3x256xf32>
    %434 = arith.divf %432, %433 : vector<3x256xf32>
    %435 = vector.broadcast %372 : vector<1x256xf32> to vector<3x256xf32>
    %436 = arith.mulf %435, %434 : vector<3x256xf32>
    %cst_121 = arith.constant 1.000000e+00 : f32
    %437 = vector.broadcast %cst_121 : f32 to vector<1x256xf32>
    %438 = arith.subf %437, %372 : vector<1x256xf32>
    %439 = vector.broadcast %438 : vector<1x256xf32> to vector<3x256xf32>
    %440 = arith.addf %436, %439 : vector<3x256xf32>
    %441 = arith.mulf %372, %381 : vector<1x256xf32>
    %cst_122 = arith.constant 1.000000e+00 : f32
    %442 = vector.broadcast %cst_122 : f32 to vector<1x256xf32>
    %443 = arith.subf %442, %372 : vector<1x256xf32>
    %cst_123 = arith.constant 0.000000e+00 : f32
    %444 = vector.broadcast %cst_123 : f32 to vector<1x256xf32>
    %445 = arith.mulf %443, %444 : vector<1x256xf32>
    %446 = arith.addf %441, %445 : vector<1x256xf32>
    %447 = arith.mulf %372, %382 : vector<1x256xf32>
    %cst_124 = arith.constant 1.000000e+00 : f32
    %448 = vector.broadcast %cst_124 : f32 to vector<1x256xf32>
    %449 = arith.subf %448, %372 : vector<1x256xf32>
    %cst_125 = arith.constant 0.000000e+00 : f32
    %450 = vector.broadcast %cst_125 : f32 to vector<1x256xf32>
    %451 = arith.mulf %449, %450 : vector<1x256xf32>
    %452 = arith.addf %447, %451 : vector<1x256xf32>
    %453 = arith.mulf %372, %383 : vector<1x256xf32>
    %cst_126 = arith.constant 1.000000e+00 : f32
    %454 = vector.broadcast %cst_126 : f32 to vector<1x256xf32>
    %455 = arith.subf %454, %372 : vector<1x256xf32>
    %cst_127 = arith.constant 1.000000e+00 : f32
    %456 = vector.broadcast %cst_127 : f32 to vector<1x256xf32>
    %457 = arith.mulf %455, %456 : vector<1x256xf32>
    %458 = arith.addf %453, %457 : vector<1x256xf32>
    %cst_128 = arith.constant 1.000000e+00 : f32
    %459 = vector.broadcast %cst_128 : f32 to vector<1x256xf32>
    %460 = arith.addf %425, %459 : vector<1x256xf32>
    %cst_129 = arith.constant 5.000000e-01 : f32
    %461 = vector.broadcast %cst_129 : f32 to vector<1x256xf32>
    %462 = arith.mulf %460, %461 : vector<1x256xf32>
    %cst_130 = arith.constant 5.000000e-01 : f32
    %463 = vector.broadcast %cst_130 : f32 to vector<1x256xf32>
    %464 = arith.subf %462, %463 : vector<1x256xf32>
    %465 = arith.mulf %372, %464 : vector<1x256xf32>
    %cst_131 = arith.constant 5.000000e-01 : f32
    %466 = vector.broadcast %cst_131 : f32 to vector<1x256xf32>
    %467 = arith.addf %466, %465 : vector<1x256xf32>
    %468 = arith.mulf %372, %467 : vector<1x256xf32>
    %cst_132 = arith.constant 1.000000e+00 : f32
    %469 = vector.broadcast %cst_132 : f32 to vector<1x256xf32>
    %470 = arith.subf %469, %372 : vector<1x256xf32>
    %cst_133 = arith.constant 0.000000e+00 : f32
    %471 = vector.broadcast %cst_133 : f32 to vector<1x256xf32>
    %472 = arith.mulf %470, %471 : vector<1x256xf32>
    %473 = arith.addf %468, %472 : vector<1x256xf32>
    %cst_134 = arith.constant 1.000000e+00 : f32
    %474 = vector.broadcast %cst_134 : f32 to vector<1x256xf32>
    %475 = arith.addf %426, %474 : vector<1x256xf32>
    %cst_135 = arith.constant 5.000000e-01 : f32
    %476 = vector.broadcast %cst_135 : f32 to vector<1x256xf32>
    %477 = arith.mulf %475, %476 : vector<1x256xf32>
    %cst_136 = arith.constant 5.000000e-01 : f32
    %478 = vector.broadcast %cst_136 : f32 to vector<1x256xf32>
    %479 = arith.subf %477, %478 : vector<1x256xf32>
    %480 = arith.mulf %372, %479 : vector<1x256xf32>
    %cst_137 = arith.constant 5.000000e-01 : f32
    %481 = vector.broadcast %cst_137 : f32 to vector<1x256xf32>
    %482 = arith.addf %481, %480 : vector<1x256xf32>
    %483 = arith.mulf %372, %482 : vector<1x256xf32>
    %cst_138 = arith.constant 1.000000e+00 : f32
    %484 = vector.broadcast %cst_138 : f32 to vector<1x256xf32>
    %485 = arith.subf %484, %372 : vector<1x256xf32>
    %cst_139 = arith.constant 0.000000e+00 : f32
    %486 = vector.broadcast %cst_139 : f32 to vector<1x256xf32>
    %487 = arith.mulf %485, %486 : vector<1x256xf32>
    %488 = arith.addf %483, %487 : vector<1x256xf32>
    %cst_140 = arith.constant 1.000000e+00 : f32
    %489 = vector.broadcast %cst_140 : f32 to vector<1x256xf32>
    %490 = arith.addf %427, %489 : vector<1x256xf32>
    %cst_141 = arith.constant 5.000000e-01 : f32
    %491 = vector.broadcast %cst_141 : f32 to vector<1x256xf32>
    %492 = arith.mulf %490, %491 : vector<1x256xf32>
    %cst_142 = arith.constant 1.000000e+00 : f32
    %493 = vector.broadcast %cst_142 : f32 to vector<1x256xf32>
    %494 = arith.subf %492, %493 : vector<1x256xf32>
    %495 = arith.mulf %372, %494 : vector<1x256xf32>
    %cst_143 = arith.constant 1.000000e+00 : f32
    %496 = vector.broadcast %cst_143 : f32 to vector<1x256xf32>
    %497 = arith.addf %496, %495 : vector<1x256xf32>
    %498 = arith.mulf %372, %497 : vector<1x256xf32>
    %cst_144 = arith.constant 1.000000e+00 : f32
    %499 = vector.broadcast %cst_144 : f32 to vector<1x256xf32>
    %500 = arith.subf %499, %372 : vector<1x256xf32>
    %cst_145 = arith.constant 1.000000e+00 : f32
    %501 = vector.broadcast %cst_145 : f32 to vector<1x256xf32>
    %502 = arith.mulf %500, %501 : vector<1x256xf32>
    %503 = arith.addf %498, %502 : vector<1x256xf32>
    %cst_146 = arith.constant 0.000000e+00 : f32
    %504 = vector.broadcast %cst_146 : f32 to vector<3x256xf32>
    %505 = tpu.concatenate %440, %372, %446, %452, %458, %473, %488, %503, %428, %283, %284, %504 in 0 : vector<3x256xf32>, vector<1x256xf32>, vector<1x256xf32>, vector<1x256xf32>, vector<1x256xf32>, vector<1x256xf32>, vector<1x256xf32>, vector<1x256xf32>, vector<1x256xf32>, vector<1x256xf32>, vector<1x256xf32>, vector<3x256xf32> -> vector<16x256xf32>
    %c0_147 = arith.constant 0 : index
    %c0_148 = arith.constant 0 : index
    %c0_149 = arith.constant 0 : index
    %506 = vector.load %arg3[%c0_147, %c0_148, %c0_149] : memref<1x16x256xf32, #tpu.memory_space<vmem>>, vector<1x16x256xf32>
    %507 = vector.shape_cast %506 : vector<1x16x256xf32> to vector<16x256xf32>
    %508 = vector.shape_cast %505 : vector<16x256xf32> to vector<1x16x256xf32>
    tpu.vector_store %arg3[%c0_147, %c0_148, %c0_149], %508 {strides = array<i32>} : memref<1x16x256xf32, #tpu.memory_space<vmem>>, vector<1x16x256xf32>,
    return
  }
  func.func @transform_0(%arg0: i32) -> (i32, i32) {
    %c0_i32 = arith.constant 0 : i32
    %c0_i32_0 = arith.constant 0 : i32
    return %arg0, %c0_i32 : i32, i32
  }
  func.func @transform_1(%arg0: i32) -> (i32, i32) {
    %c0_i32 = arith.constant 0 : i32
    %c0_i32_0 = arith.constant 0 : i32
    %c0_i32_1 = arith.constant 0 : i32
    return %c0_i32, %c0_i32_0 : i32, i32
  }
  func.func @transform_2(%arg0: i32) -> (i32, i32, i32) {
    %c0_i32 = arith.constant 0 : i32
    %c0_i32_0 = arith.constant 0 : i32
    %c0_i32_1 = arith.constant 0 : i32
    return %arg0, %c0_i32, %c0_i32_0 : i32, i32, i32
  }
}

</mosaic_0001>

<bundles_post_ra>
// kernel: nvdiff_rasterizer_forward.1
= control target key start
LH: loop header
LB: loop body
LE: loop exit
PB: predicated region body
PF: predicated region fallthrough
CT: control target
= control target key end

     0   :  { %7 = vsyncpa [#allocation3], 0  ;;  %s2198_s0 = inlined_call_operand.vmem [shape: f32[1,65], index: 0, kind: input, shape index: {}]   ;;  %s2199_s1 = inlined_call_operand.vmem [shape: bf16[8,64], index: 1, kind: input, shape index: {}]   ;;  %s2200_s2 = inlined_call_operand.vmem [shape: f32[1,16,256], index: 2, kind: output, shape index: {}]  }
   0x1   :  { %s14_s11 = sshll.u32 %s2198_s0, 4  ;;  %s15_s11 = int_to_ptr.vmem [resolvable:$true] %s14_s11 }
   0x2   :  { %s1045_s12 = scalar_lea.vmem %s15_s11, 16  ;;  %p1050_p1 = scmp.lt.s32.totalorder %s15_s11, %s15_s11 }
   0x3   :  { %p1046_p0 = scmp.ne.s32.totalorder %s15_s11, %s1045_s12  ;;  %p1051_p2 = scmp.lt.s32.totalorder %s1045_s12, %s1045_s12 }
   0x5   :  { %p1052_p3 = por %p1051_p2, %p1050_p1 }
   0x7   :  { %p1053_p4 = pnand %p1052_p3, %p1046_p0 }
   0x9   :  { %1056 = shalt.err (!%p1053_p4)
}
   0xa   :  { %s1059_s13 = smov [#allocation2]  }
   0xb   :  { %17 = dma.vmem_to_smem %s15_s11, 16, %s1059_s13, [#allocation3]  }
   0xc   :  { %1057 = dma.done.wait [#allocation3], 16  }
   0xd   :  { %1058 = vsyncadd [#allocation3], 4294967280 }
   0xe   :  { %23 = sfence }
   0xf   :  { %v25_v0 = vlaneseq  ;;  %s1080_s14 = sld [smem:[#allocation2]]  ;;  %s1082_s15 = sld [smem:[#allocation2 + $0x1]] }
  0x10   :  { %s1084_s0 = sld [smem:[#allocation2 + $0x2]]  ;;  %s1086_s16 = sld [smem:[#allocation2 + $0x3]] }
  0x11   :  { %v26_v1 = vand.u32 127, %v25_v0  ;;  %s1088_s17 = sld [smem:[#allocation2 + $0x4]]  ;;  %s1090_s18 = sld [smem:[#allocation2 + $0x5]]  ;;  %v1094_v6 = vshrl.u32 %v25_v0, 7 }
  0x12   :  { %s1092_s19 = sld [smem:[#allocation2 + $0x7]]  ;;  %s1096_s20 = sld [smem:[#allocation2 + $0x8]] }
  0x13   :  { %v27_v2 = vadd.s32 128, %v26_v1  ;;  %v28_v3 = vcvt.s32.f32 %v26_v1  ;;  %s1098_s21 = sld [smem:[#allocation2 + $0x9]]  ;;  %s1100_s22 = sld [smem:[#allocation2 + $0x6]]  ;;  %v1113_v11 = vadd.s32 8, %v1094_v6  ;;  %v1116_v12 = vadd.s32 16, %v1094_v6 }
  0x14   :  { %s1102_s23 = sld [smem:[#allocation2 + $0xa]]  ;;  %s1104_s24 = sld [smem:[#allocation2 + $0xb]]  ;;  %v1124_v16 = vadd.s32 24, %v1094_v6  ;;  %v1134_v23 = vadd.s32 32, %v1094_v6  ;;  %v1137_v24 = vadd.s32 40, %v1094_v6  ;;  %v1151_v35 = vadd.s32 48, %v1094_v6 }
  0x15   :  { %v29_v4 = vcvt.s32.f32 %v27_v2  ;;  %v30_v5 = vadd.f32 0.5, %v28_v3  ;;  %s1106_s25 = sld [smem:[#allocation2 + $0xc]]  ;;  %s1108_s26 = sld [smem:[#allocation2 + $0x1d]]  ;;  %v53_v14 = vstv %s1080_s14  ;;  %v57_v17 = vstv %s1082_s15 }
  0x16   :  { %s1110_s27 = sld [smem:[#allocation2 + $0x20]]  ;;  %s1119_s28 = sld [smem:[#allocation2 + $0xd]]  ;;  %v63_v18 = vstv %s1084_s0  ;;  %v67_v19 = vstv %s1086_s16  ;;  %v1154_v36 = vadd.s32 56, %v1094_v6 }
  0x17   :  { %v31_v7 = vadd.f32 0.5, %v29_v4  ;;  %v32_v8 = vmul.f32 0.0625, %v30_v5  ;;  %s1121_s29 = sld [smem:[#allocation2 + $0xf]]  ;;  %s1129_s30 = sld [smem:[#allocation2 + $0x1c]]  ;;  %v71_v25 = vstv %s1088_s17  ;;  %v77_v26 = vstv %s1090_s18 }
  0x18   :  { %s1131_s3 = sld [smem:[#allocation2 + $0x1f]]  ;;  %s1141_s4 = sld [smem:[#allocation2 + $0x11]]  ;;  %v95_v31 = vstv %s1092_s19  ;;  %v99_v32 = vstv %s1096_s20 }
  0x19   :  { %v33_v9 = vmul.f32 0.0625, %v31_v7  ;;  %v34_v10 = vfloor.f32 %v32_v8  ;;  %s1143_s5 = sld [smem:[#allocation2 + $0x1e]]  ;;  %v105_v33 = vstv %s1098_s21  ;;  %s1148_s6 = sld [smem:[#allocation2 + $0x21]]  ;;  %v111_v39 = vstv %s1100_s22 }
  0x1a   :  { %v119_v40 = vstv %s1102_s23  ;;  %s1158_s7 = sld [smem:[#allocation2 + $0xe]]  ;;  %s1160_s8 = sld [smem:[#allocation2 + $0x23]]  ;;  %v123_v46 = vstv %s1104_s24 }
  0x1b   :  { %v35_v13 = vfloor.f32 %v33_v9  ;;  %v36_v15 = vmul.f32 16.0, %v34_v10  ;;  %v46_v20 = vadd.f32 0.5, %v34_v10  ;;  %v247_v41 = vstv %s1108_s26  ;;  %s1164_s9 = sld [smem:[#allocation2 + $0x24]]  ;;  %s1166_s10 = sld [smem:[#allocation2 + $0x25]] }
  0x1c   :  { %v261_v42 = vstv %s1110_s27  ;;  %v127_v47 = vstv %s1106_s25  ;;  %v149_v48 = vstv %s1119_s28  ;;  %s1173_s11 = sld [smem:[#allocation2 + $0x26]]  ;;  %s1178_s12 = sld [smem:[#allocation2 + $0x27]] }
  0x1d   :  { %v37_v21 = vmul.f32 16.0, %v35_v13  ;;  %v47_v22 = vadd.f32 0.5, %v35_v13  ;;  %v38_v27 = vsub.f32 %v28_v3, %v36_v15  ;;  %v48_v28 = vmul.f32 0.125, %v46_v20  ;;  %s1180_s13 = sld [smem:[#allocation2 + $0x28]]  ;;  %s1203_s14 = sld [smem:[#allocation2 + $0x22]] }
  0x1e   :  { %v153_v50 = vstv %s1121_s29  ;;  %v243_v51 = vstv %s1129_s30  ;;  %v257_v52 = vstv %s1131_s3  ;;  %v159_v57 = vstv %s1141_s4  ;;  %s1276_s15 = sld [smem:[#allocation2 + $0x10]]  ;;  %s1280_s0 = sld [smem:[#allocation2 + $0x12]] }
  0x1f   :  { %v39_v29 = vsub.f32 %v29_v4, %v37_v21  ;;  %v49_v30 = vmul.f32 0.125, %v47_v22  ;;  %v40_v34 = vadd.f32 0.5, %v38_v27  ;;  %v1168_v44 = vadd.f32 -1.0, %v48_v28  ;;  %s1282_s16 = sld [smem:[#allocation2 + $0x29]]  ;;  %s1294_s17 = sld [smem:[#allocation2 + $0x2b]] }
  0x20   :  { %v253_v58 = vstv %s1143_s5  ;;  %v267_v1 = vstv %s1148_s6  ;;  %v165_v10 = vstv %s1158_s7  ;;  %v285_v13 = vstv %s1160_s8  ;;  %s1296_s18 = sld [smem:[#allocation2 + $0x2d]]  ;;  %s1310_s19 = sld [smem:[#allocation2 + $0x2a]] }
  0x21   :  { %v41_v37 = vadd.f32 0.5, %v39_v29  ;;  %v932_v38 = vadd.f32 -1.0, %v49_v30  ;;  %v42_v43 = vmul.f32 0.125, %v40_v34  ;;  %v58_v60 = vmul.f32 %v1168_v44, %v57_v17  ;;  %s1314_s20 = sld [smem:[#allocation2 + $0x2c]]  ;;  %s1331_s21 = sld [smem:[#allocation2 + $0x2e]] }
  0x22   :  { %v72_v4 = vmul.f32 %v1168_v44, %v71_v25  ;;  %v289_v15 = vstv %s1164_s9  ;;  %v313_v27 = vstv %s1178_s12  ;;  %s1362_s22 = sld [smem:[#allocation2 + $0x13]]  ;;  %s1364_s23 = sld [smem:[#allocation2 + $0x16]] }
  0x23   :  { %v43_v45 = vmul.f32 0.125, %v41_v37  ;;  %v59_v49 = vmul.f32 %v932_v38, %v57_v17  ;;  %v73_v54 = vmul.f32 %v932_v38, %v71_v25  ;;  %v249_v55 = vmul.f32 %v932_v38, %v247_v41  ;;  %s1420_s24 = sld [smem:[#allocation2 + $0x19]]  ;;  %s1433_s25 = sld [smem:[#allocation2 + $0x14]] }
  0x24   :  { %v263_v56 = vmul.f32 %v932_v38, %v261_v42  ;;  %v1186_v59 = vadd.f32 -1.0, %v42_v43  ;;  %v295_v17 = vstv %s1166_s10  ;;  %v309_v25 = vstv %s1173_s11  ;;  %s1456_s26 = sld [smem:[#allocation2 + $0x17]]  ;;  %s1501_s27 = sld [smem:[#allocation2 + $0x1a]] }
  0x25   :  { %v930_v53 = vadd.f32 -1.0, %v43_v45  ;;  %v317_v28 = vstv %s1180_s13  ;;  %s1504_s30 = sld [smem:[#allocation2 + $0x15]]  ;;  %s1529_s3 = sld [smem:[#allocation2 + $0x18]] }
  0x26   :  { %v54_v2 = vmul.f32 %v1186_v59, %v53_v14  ;;  %v68_v3 = vmul.f32 %v1186_v59, %v67_v19  ;;  %v244_v37 = vmul.f32 %v1186_v59, %v243_v51  ;;  %s1551_s28 = sld [smem:[#allocation2 + $0x1b]]  ;;  %s1729_s29 = sld [smem:[#allocation2 + $0x2f]] }
  0x27   :  { %v55_v61 = vmul.f32 %v930_v53, %v53_v14  ;;  %v69_v62 = vmul.f32 %v930_v53, %v67_v19  ;;  %v245_v63 = vmul.f32 %v930_v53, %v243_v51  ;;  %v259_v0 = vmul.f32 %v930_v53, %v257_v52  ;;  %s1898_s4 = sld [smem:[#allocation2 + $0x32]]  ;;  %s1900_s5 = sld [smem:[#allocation2 + $0x35]] }
  0x28   :  { %v60_v21 = vadd.f32 %v58_v60, %v54_v2  ;;  %v74_v34 = vadd.f32 %v72_v4, %v68_v3  ;;  %v301_v4 = vstv %s1203_s14  ;;  %s1903_s6 = sld [smem:[#allocation2 + $0x30]]  ;;  %s1912_s7 = sld [smem:[#allocation2 + $0x33]] }
  0x29   :  { %v61_v5 = vadd.f32 %v59_v49, %v55_v61  ;;  %v75_v7 = vadd.f32 %v73_v54, %v69_v62  ;;  %v251_v8 = vadd.f32 %v249_v55, %v245_v63  ;;  %v265_v9 = vadd.f32 %v263_v56, %v259_v0  ;;  %s1914_s8 = sld [smem:[#allocation2 + $0x36]]  ;;  %s1918_s9 = sld [smem:[#allocation2 + $0x31]] }
  0x2a   :  { %v64_v51 = vadd.f32 %v63_v18, %v60_v21  ;;  %v248_v55 = vmul.f32 %v1168_v44, %v247_v41  ;;  %v78_v41 = vadd.f32 %v77_v26, %v74_v34  ;;  %s1927_s10 = sld [smem:[#allocation2 + $0x34]]  ;;  %s1929_s11 = sld [smem:[#allocation2 + $0x37]] }
  0x2b   :  { %v65_v14 = vadd.f32 %v63_v18, %v61_v5  ;;  %v79_v19 = vadd.f32 %v77_v26, %v75_v7  ;;  %v1211_v20 = vadd.f32 %v253_v58, %v251_v8  ;;  %v1215_v22 = vadd.f32 %v267_v1, %v265_v9  ;;  %s2041_s14 = sld [smem:[#allocation2 + $0x39]] }
  0x2c   :  { %v80_v26 = vsub.f32 1.0, %v64_v51  ;;  %vm84_vm5 = vcmp.ge.f32.partialorder %v64_v51, 0.0  ;;  %vm86_vm6 = vcmp.ge.f32.partialorder %v78_v41, 0.0 }
  0x2d   :  { %v81_v29 = vsub.f32 1.0, %v65_v14  ;;  %v97_v30 = vmul.f32 %v95_v31, %v65_v14  ;;  %v101_v38 = vmul.f32 %v99_v32, %v79_v19  ;;  %v1227_v43 = vmul.f32 %v119_v40, %v65_v14  ;;  %vm1342_vm10 = vmand %vm84_vm5, %vm86_vm6 }
  0x2e   :  { %v1231_v45 = vmul.f32 %v123_v46, %v79_v19  ;;  %v271_v49 = vsub.f32 1.0, %v1211_v20  ;;  %v287_v54 = vmul.f32 %v285_v13, %v1211_v20  ;;  %v291_v62 = vmul.f32 %v289_v15, %v1215_v22 }
  0x2f   :  { %v83_v53 = vsub.f32 %v81_v29, %v79_v19  ;;  %v103_v56 = vadd.f32 %v101_v38, %v97_v30  ;;  %v1257_v18 = vmul.f32 %v309_v25, %v1211_v20  ;;  %v1268_v5 = vmul.f32 %v313_v27, %v1215_v22 }
  0x30   :  { %v131_v60 = vadd.f32 %v1231_v45, %v1227_v43  ;;  %v1243_v61 = vsub.f32 %v271_v49, %v1215_v22  ;;  %v293_v2 = vadd.f32 %v291_v62, %v287_v54  ;;  %vm85_vm0 = vcmp.ge.f32.partialorder %v65_v14, 0.0 }
  0x31   :  { %v107_v63 = vmul.f32 %v105_v33, %v83_v53  ;;  %v1252_v0 = vmul.f32 %v127_v47, %v83_v53  ;;  %vm87_vm1 = vcmp.ge.f32.partialorder %v79_v19, 0.0  ;;  %v321_v21 = vadd.f32 %v1268_v5, %v1257_v18 }
  0x32   :  { %v297_v3 = vmul.f32 %v295_v17, %v1243_v61  ;;  %v1274_v9 = vmul.f32 %v317_v28, %v1243_v61  ;;  %v250_v29 = vadd.f32 %v248_v55, %v244_v37  ;;  %v82_v34 = vsub.f32 %v80_v26, %v78_v41  ;;  %vm1306_vm2 = vmand %vm85_vm0, %vm87_vm1 }
  0x33   :  { %v109_v7 = vadd.f32 %v107_v63, %v103_v56  ;;  %v133_v8 = vadd.f32 %v131_v60, %v1252_v0  ;;  %v96_v38 = vmul.f32 %v95_v31, %v64_v51  ;;  %v258_v49 = vmul.f32 %v1186_v59, %v257_v52 }
  0x34   :  { %v323_v56 = vadd.f32 %v321_v21, %v1274_v9  ;;  %v100_v37 = vmul.f32 %v99_v32, %v78_v41  ;;  %v1302_v55 = vmul.f32 %v119_v40, %v64_v51  ;;  %vm91_vm3 = vcmp.ge.f32.partialorder %v83_v53, 0.0 }
  0x35   :  { %v135_v30 = vand.u32 2147483647, %v133_v8  ;;  %v1291_v54 = vadd.f32 %v111_v39, %v109_v7  ;;  %v299_v52 = vadd.f32 %v297_v3, %v293_v2  ;;  %v106_v59 = vmul.f32 %v105_v33, %v82_v34  ;;  %vm1326_vm7 = vmand %vm1306_vm2, %vm91_vm3 }
  0x36   :  { %v325_v32 = vand.u32 2147483647, %v323_v56  ;;  %v102_v40 = vadd.f32 %v100_v37, %v96_v38  ;;  %v1318_v14 = vmul.f32 %v123_v46, %v78_v41  ;;  %v1322_v19 = vmul.f32 %v127_v47, %v82_v34 }
  0x37   :  { %vm137_vm4 = vcmp.gt.f32.partialorder %v135_v30, 1e-12  ;;  %vm115_vm8 = vcmp.lt.f32.partialorder %v1291_v54, 1e+30  ;;  %v1337_v47 = vadd.f32 %v253_v58, %v250_v29  ;;  %v262_v62 = vmul.f32 %v1168_v44, %v261_v42 }
  0x38   :  { %v139_v60 = vsel %vm137_vm4, %v133_v8, 1.0  ;;  %vm327_vm9 = vcmp.gt.f32.partialorder %v325_v32, 1e-12  ;;  %v108_v46 = vadd.f32 %v106_v59, %v102_v40  ;;  %v130_v53 = vadd.f32 %v1318_v14, %v1302_v55  ;;  %vm1355_vm12 = vmand %vm1326_vm7, %vm115_vm8 }
  0x39   :  { %1021 = vrcp.f32 %v139_v60  ;;  %v329_v51 = vsel %vm327_vm9, %v323_v56, 1.0  ;;  %vm90_vm11 = vcmp.ge.f32.partialorder %v82_v34, 0.0  ;;  %v1060_v2 = vmov 0  }
  0x3a   :  { %1023 = vrcp.f32 %v329_v51  ;;  %v1348_v41 = vadd.f32 %v111_v39, %v108_v46  ;;  %v132_v58 = vadd.f32 %v130_v53, %v1322_v19  ;;  %716 = vmatprep.mubr.bf16.mxu0 %v1060_v2  ;;  %v169_v44 = vstv %s1276_s15  ;;  %vm92_vm13 = vmand %vm1342_vm10, %vm90_vm11  ;;  %s2043_s15 = sld [smem:[#allocation2 + $0x3b]] }
  0x3b   :  { %v175_v3 = vstv %s1280_s0  ;;  %v264_v7 = vadd.f32 %v262_v62, %v258_v49  ;;  %v270_v39 = vsub.f32 1.0, %v1337_v47  ;;  %v339_v8 = vstv %s1282_s16  ;;  %s2045_s0 = sld [smem:[#allocation2 + $0x3c]]  ;;  %s2047_s16 = sld [smem:[#allocation2 + $0x3a]] }
  0x3c   :  { %v343_v26 = vstv %s1294_s17  ;;  %v349_v21 = vstv %s1296_s18  ;;  %v134_v29 = vand.u32 2147483647, %v132_v58  ;;  %v303_v30 = vadd.f32 %v301_v4, %v299_v52  ;;  %s2049_s17 = sld [smem:[#allocation2 + $0x3d]]  ;;  %s2051_s18 = sld [smem:[#allocation2 + $0x3e]] }
  0x3d   :  { %v355_v38 = vstv %s1310_s19  ;;  %vm114_vm14 = vcmp.lt.f32.partialorder %v1348_v41, 1e+30  ;;  %v1378_v49 = vadd.f32 %v267_v1, %v264_v7  ;;  %v229_v56 = vsel %vm1355_vm12, %v1291_v54, 1e+30  ;;  %s2053_s19 = sld [smem:[#allocation2 + $0x3f]] }
  0x3e   :  { %v2202_v37 = vstv %s1314_s20  ;;  %vm136_vm15 = vcmp.gt.f32.partialorder %v134_v29, 1e-12  ;;  %v1387_v31 = vmul.f32 %v309_v25, %v1337_v47  ;;  %v286_v59 = vmul.f32 %v285_v13, %v1337_v47  ;;  %vm1400_vm1 = vmand %vm92_vm13, %vm114_vm14 }
  0x3f   :  { %v138_v34 = vsel %vm136_vm15, %v132_v58, 1.0  ;;  %v1390_v52 = vsub.f32 %v270_v39, %v1378_v49  ;;  %v290_v1 = vmul.f32 %v289_v15, %v1378_v49  ;;  %vm275_vm0 = vcmp.ge.f32.partialorder %v1211_v20, 0.0 }
  0x40   :  { %v2201_v54 = vstv %s1331_s21  ;;  %1025 = vrcp.f32 %v138_v34  ;;  %v1407_v25 = vmul.f32 %v313_v27, %v1378_v49  ;;  %vm277_vm2 = vcmp.ge.f32.partialorder %v1215_v22, 0.0 }
  0x41   :  { %vm281_vm3 = vcmp.ge.f32.partialorder %v1243_v61, 0.0  ;;  %vm1411_vm4 = vcmp.lt.f32.partialorder %v303_v30, %v229_v56  ;;  %v1418_v15 = vmul.f32 %v317_v28, %v1390_v52  ;;  %v228_v28 = vsel %vm1400_vm1, %v1348_v41, 1e+30  ;;  %vm279_vm5 = vmand %vm275_vm0, %vm277_vm2 }
  0x42   :  { %v320_v46 = vadd.f32 %v1407_v25, %v1387_v31  ;;  %v292_v53 = vadd.f32 %v290_v1, %v286_v59  ;;  %v2210_v51 = vstv %s1364_s23  ;;  %v296_v30 = vmul.f32 %v295_v17, %v1390_v52  ;;  %vm1479_vm6 = vmand %vm279_vm5, %vm281_vm3 }
  0x43   :  { %v1022_v32 = vpop.eup %1021  ;;  %vm1512_vm7 = vmand %vm1479_vm6, %vm1411_vm4  ;;  %vm274_vm9 = vcmp.ge.f32.partialorder %v1337_v47, 0.0  ;;  %vm276_vm10 = vcmp.ge.f32.partialorder %v1378_v49, 0.0  ;;  %vm280_vm11 = vcmp.ge.f32.partialorder %v1390_v52, 0.0 }
  0x44   :  { %v1423_v27 = vmul.f32 %v1022_v32, %v1227_v43  ;;  %v1426_v40 = vmul.f32 %v1022_v32, %v1231_v45  ;;  %v1429_v33 = vmul.f32 %v1022_v32, %v1252_v0  ;;  %v2211_v43 = vstv %s1362_s22  ;;  %v1024_v62 = vpop.eup %1023  ;;  %vm1641_vm14 = vmand %vm274_vm9, %vm276_vm10 }
  0x45   :  { %v1465_v39 = vmul.f32 %v1024_v62, %v1257_v18  ;;  %v1468_v29 = vmul.f32 %v1024_v62, %v1268_v5  ;;  %v1471_v20 = vmul.f32 %v1024_v62, %v1274_v9  ;;  %v322_v56 = vadd.f32 %v320_v46, %v1418_v15  ;;  %vm282_vm6 = vmand %vm1641_vm14, %vm280_vm11 }
  0x46   :  { %v151_v45 = vmul.f32 %v149_v48, %v1423_v27  ;;  %v155_v0 = vmul.f32 %v153_v50, %v1426_v40  ;;  %v161_v63 = vmul.f32 %v159_v57, %v1429_v33  ;;  %v167_v58 = vmul.f32 %v165_v10, %v1423_v27 }
  0x47   :  { %v171_v2 = vmul.f32 %v169_v44, %v1426_v40  ;;  %v177_v7 = vmul.f32 %v175_v3, %v1429_v33  ;;  %v341_v18 = vmul.f32 %v339_v8, %v1465_v39  ;;  %v345_v5 = vmul.f32 %v343_v26, %v1468_v29 }
  0x48   :  { %v157_v22 = vadd.f32 %v155_v0, %v151_v45  ;;  %v357_v9 = vmul.f32 %v355_v38, %v1465_v39  ;;  %v351_v1 = vmul.f32 %v349_v21, %v1471_v20  ;;  %v361_v61 = vmul.f32 %v2202_v37, %v1468_v29 }
  0x49   :  { %v173_v34 = vadd.f32 %v171_v2, %v167_v58  ;;  %v367_v32 = vmul.f32 %v2201_v54, %v1471_v20  ;;  %v347_v62 = vadd.f32 %v345_v5, %v341_v18  ;;  %v324_v45 = vand.u32 2147483647, %v322_v56 }
  0x4a   :  { %v163_v17 = vadd.f32 %v161_v63, %v157_v22  ;;  %v2207_v0 = vstv %s1420_s24  ;;  %v1026_v58 = vpop.eup %1025  ;;  %v298_v22 = vadd.f32 %v296_v30, %v292_v53  ;;  %v2208_v53 = vstv %s1456_s26 }
  0x4b   :  { %v179_v46 = vadd.f32 %v177_v7, %v173_v34  ;;  %v363_v7 = vadd.f32 %v361_v61, %v357_v9  ;;  %v2209_v34 = vstv %s1433_s25  ;;  %v353_v5 = vadd.f32 %v351_v1, %v347_v62 }
  0x4c   :  { %v233_v63 = vsel %vm1355_vm12, %v163_v17, 0.0  ;;  %v142_v17 = vmul.f32 %v1026_v58, %v1302_v55  ;;  %v144_v13 = vmul.f32 %v1026_v58, %v1318_v14  ;;  %v1522_v54 = vmul.f32 %v1026_v58, %v1322_v19 }
  0x4d   :  { %v235_v18 = vsel %vm1355_vm12, %v179_v46, 0.0  ;;  %v369_v59 = vadd.f32 %v367_v32, %v363_v7  ;;  %vm1524_vm8 = vcmp.gt.f32.partialorder %v324_v45, 1e-12  ;;  %v1533_v30 = vsel %vm1512_vm7, %v353_v5, %v233_v63 }
  0x4e   :  { %v150_v55 = vmul.f32 %v149_v48, %v142_v17  ;;  %v154_v14 = vmul.f32 %v153_v50, %v144_v13  ;;  %v166_v19 = vmul.f32 %v165_v10, %v142_v17  ;;  %v431_v1 = vmul.f32 8.0, %v1533_v30 }
  0x4f   :  { %v1543_v9 = vsel %vm1512_vm7, %v369_v59, %v235_v18  ;;  %v160_v61 = vmul.f32 %v159_v57, %v1522_v54  ;;  %v170_v32 = vmul.f32 %v169_v44, %v144_v13  ;;  %v176_v10 = vmul.f32 %v175_v3, %v1522_v54 }
  0x50   :  { %v435_v48 = vmul.f32 8.0, %v1543_v9  ;;  %v156_v50 = vadd.f32 %v154_v14, %v150_v55  ;;  %v328_v46 = vsel %vm1524_vm8, %v322_v56, 1.0  ;;  %v989_v62 = vadd.f32 -0.5, %v431_v1 }
  0x51   :  { %v172_v45 = vadd.f32 %v170_v32, %v166_v19  ;;  %1027 = vrcp.f32 %v328_v46  ;;  %v2204_v57 = vstv %s1501_s27  ;;  %v182_v44 = vmul.f32 %v2211_v43, %v142_v17 }
  0x52   :  { %v991_v58 = vadd.f32 -0.5, %v435_v48  ;;  %v186_v63 = vmul.f32 %v2210_v51, %v144_v13  ;;  %v2203_v7 = vstv %s1504_s30  ;;  %v439_v18 = vfloor.f32 %v989_v62 }
  0x53   :  { %v1565_v5 = vadd.f32 %v160_v61, %v156_v50  ;;  %v302_v3 = vadd.f32 %v301_v4, %v298_v22  ;;  %v192_v37 = vmul.f32 %v2207_v0, %v1522_v54  ;;  %v1572_v59 = vadd.f32 %v176_v10, %v172_v45 }
  0x54   :  { %v441_v56 = vfloor.f32 %v991_v58  ;;  %v188_v55 = vadd.f32 %v186_v63, %v182_v44  ;;  %v198_v14 = vmul.f32 %v2209_v34, %v142_v17  ;;  %v443_v19 = vsub.f32 %v989_v62, %v439_v18 }
  0x55   :  { %v1012_v1 = vtrunc.f32 %v439_v18  ;;  %v202_v4 = vmul.f32 %v2208_v53, %v144_v13  ;;  %v2205_v22 = vstv %s1529_s3  ;;  %v208_v50 = vmul.f32 %v2204_v57, %v1522_v54 }
  0x56   :  { %v445_v61 = vsub.f32 %v991_v58, %v441_v56  ;;  %v1016_v32 = vtrunc.f32 %v441_v56  ;;  %v1581_v48 = vadd.f32 %v192_v37, %v188_v55  ;;  %v214_v45 = vmul.f32 %v2203_v7, %v142_v17 }
  0x57   :  { %v1013_v10 = vcvt.f32.s32 %v1012_v1  ;;  %v204_v46 = vadd.f32 %v202_v4, %v198_v14  ;;  %v2206_v44 = vstv %s1551_s28  ;;  %v232_v63 = vsel %vm1400_vm1, %v1565_v5, 0.0 }
  0x58   :  { %v1017_v62 = vcvt.f32.s32 %v1016_v32  ;;  %v234_v58 = vsel %vm1400_vm1, %v1572_v59, 0.0  ;;  %v218_v18 = vmul.f32 %v2205_v22, %v144_v13  ;;  %v475_v56 = vsub.f32 1.0, %v443_v19 }
  0x59   :  { %v453_v37 = vadd.s32 1, %v1013_v10  ;;  %v477_v55 = vsub.f32 1.0, %v445_v61  ;;  %v1598_v1 = vadd.f32 %v208_v50, %v204_v46  ;;  %v451_v14 = vand.u32 7, %v1013_v10 }
  0x5a   :  { %v457_v17 = vand.u32 7, %v1017_v62  ;;  %v459_v4 = vadd.s32 1, %v1017_v62  ;;  %v1600_v32 = vmul.f32 %v445_v61, %v443_v19  ;;  %vm1606_vm13 = vcmp.lt.f32.partialorder %v302_v3, %v228_v28 }
  0x5b   :  { %v1028_v57 = vpop.eup %1027  ;;  %v455_v13 = vand.u32 7, %v453_v37  ;;  %v1610_v22 = vmul.f32 %v475_v56, %v445_v61  ;;  %v220_v50 = vadd.f32 %v218_v18, %v214_v45  ;;  %v224_v10 = vmul.f32 %v2206_v44, %v1522_v54  ;;  %vm1691_vm10 = vmand %vm282_vm6, %vm1606_vm13 }
  0x5c   :  { %v461_v46 = vand.u32 7, %v459_v4  ;;  %v463_v62 = vmul.u32 8, %v457_v17  ;;  %v1616_v41 = vmul.f32 %v1028_v57, %v1387_v31  ;;  %v1619_v28 = vmul.f32 %v1028_v57, %v1407_v25 }
  0x5d   :  { %v1621_v3 = vmul.f32 %v477_v55, %v475_v56  ;;  %v1623_v61 = vmul.f32 %v477_v55, %v443_v19  ;;  %v1626_v45 = vmul.f32 %v1028_v57, %v1418_v15  ;;  %v1628_v18 = vadd.f32 %v224_v10, %v220_v50 }
  0x5e   :  { %v1630_v54 = vadd.s32 %v463_v62, %v451_v14  ;;  %v1632_v37 = vadd.s32 %v463_v62, %v455_v13  ;;  %v469_v17 = vmul.u32 8, %v461_v46  ;;  %v340_v31 = vmul.f32 %v339_v8, %v1616_v41 }
  0x5f   :  { %v344_v15 = vmul.f32 %v343_v26, %v1619_v28  ;;  %v350_v57 = vmul.f32 %v349_v21, %v1626_v45  ;;  %v356_v19 = vmul.f32 %v355_v38, %v1616_v41  ;;  %v2234_v56 = vstv %s1314_s20  ;;  %s2055_s20 = sld [smem:[#allocation2 + $0x40]] }
  0x60   :  { %v360_v8 = vmul.f32 %v2234_v56, %v1619_v28  ;;  %v1657_v55 = vadd.s32 %v469_v17, %v451_v14  ;;  %v1659_v49 = vadd.s32 %v469_v17, %v455_v13  ;;  %vm496_vm15 = vcmp.eq.s32.totalorder %v1094_v6, %v1630_v54 }
  0x61   :  { %vm498_vm0 = vcmp.eq.s32.totalorder %v1113_v11, %v1630_v54  ;;  %v512_v47 = vsel %vm496_vm15, %v1621_v3, 0.0  ;;  %vm528_vm2 = vcmp.eq.s32.totalorder %v1094_v6, %v1632_v37  ;;  %vm530_vm3 = vcmp.eq.s32.totalorder %v1113_v11, %v1632_v37 }
  0x62   :  { %v514_v26 = vsel %vm498_vm0, %v1621_v3, 0.0  ;;  %v544_v21 = vsel %vm528_vm2, %v1623_v61, 0.0  ;;  %v546_v38 = vsel %vm530_vm3, %v1623_v61, 0.0  ;;  %vm576_vm4 = vcmp.eq.s32.totalorder %v1094_v6, %v1657_v55 }
  0x63   :  { %vm578_vm5 = vcmp.eq.s32.totalorder %v1113_v11, %v1657_v55  ;;  %v560_v14 = vadd.f32 %v544_v21, %v512_v47  ;;  %v562_v4 = vadd.f32 %v546_v38, %v514_v26  ;;  %v592_v13 = vsel %vm576_vm4, %v1610_v22, 0.0 }
  0x64   :  { %v594_v50 = vsel %vm578_vm5, %v1610_v22, 0.0  ;;  %vm624_vm8 = vcmp.eq.s32.totalorder %v1094_v6, %v1659_v49  ;;  %vm626_vm9 = vcmp.eq.s32.totalorder %v1113_v11, %v1659_v49  ;;  %v346_v10 = vadd.f32 %v344_v15, %v340_v31 }
  0x65   :  { %v362_v46 = vadd.f32 %v360_v8, %v356_v19  ;;  %v608_v62 = vadd.f32 %v592_v13, %v560_v14  ;;  %v610_v52 = vadd.f32 %v594_v50, %v562_v4  ;;  %v640_v17 = vsel %vm624_vm8, %v1600_v32, 0.0 }
  0x66   :  { %v642_v25 = vsel %vm626_vm9, %v1600_v32, 0.0  ;;  %v352_v47 = vadd.f32 %v350_v57, %v346_v10  ;;  %v2237_v26 = vstv %s1331_s21  ;;  %vm500_vm11 = vcmp.eq.s32.totalorder %v1116_v12, %v1630_v54 }
  0x67   :  { %v366_v21 = vmul.f32 %v2237_v26, %v1626_v45  ;;  %vm502_vm14 = vcmp.eq.s32.totalorder %v1124_v16, %v1630_v54  ;;  %v656_v31 = vadd.f32 %v640_v17, %v608_v62  ;;  %v658_v15 = vadd.f32 %v642_v25, %v610_v52 }
  0x68   :  { %v516_v19 = vsel %vm500_vm11, %v1621_v3, 0.0  ;;  %v518_v7 = vsel %vm502_vm14, %v1621_v3, 0.0  ;;  %v1710_v57 = vsel %vm1691_vm10, %v352_v47, %v232_v63  ;;  %vm532_vm13 = vcmp.eq.s32.totalorder %v1116_v12, %v1632_v37 }
  0x69   :  { %v368_v8 = vadd.f32 %v366_v21, %v362_v46  ;;  %vm534_vm15 = vcmp.eq.s32.totalorder %v1124_v16, %v1632_v37  ;;  %v673_v38 = vpack.c.bf16 %v658_v15, %v656_v31  ;;  %v430_v14 = vmul.f32 8.0, %v1710_v57 }
  0x6a   :  { %v548_v4 = vsel %vm532_vm13, %v1623_v61, 0.0  ;;  %v550_v13 = vsel %vm534_vm15, %v1623_v61, 0.0  ;;  %vm580_vm0 = vcmp.eq.s32.totalorder %v1116_v12, %v1657_v55  ;;  %vm582_vm2 = vcmp.eq.s32.totalorder %v1124_v16, %v1657_v55 }
  0x6b   :  { %v1725_v5 = vsel %vm1691_vm10, %v368_v8, %v234_v58  ;;  %v564_v63 = vadd.f32 %v548_v4, %v516_v19  ;;  %v566_v50 = vadd.f32 %v550_v13, %v518_v7  ;;  %684 = vmatprep.subr.bf16.mxu0 %v673_v38  ;;  %v988_v10 = vadd.f32 -0.5, %v430_v14 }
  0x6c   :  { %v434_v46 = vmul.f32 8.0, %v1725_v5  ;;  %v596_v59 = vsel %vm580_vm0, %v1610_v22, 0.0  ;;  %v598_v62 = vsel %vm582_vm2, %v1610_v22, 0.0  ;;  %vm628_vm3 = vcmp.eq.s32.totalorder %v1116_v12, %v1659_v49 }
  0x6d   :  { %v612_v58 = vadd.f32 %v596_v59, %v564_v63  ;;  %vm630_vm4 = vcmp.eq.s32.totalorder %v1124_v16, %v1659_v49  ;;  %v438_v17 = vfloor.f32 %v988_v10  ;;  %v614_v25 = vadd.f32 %v598_v62, %v566_v50 }
  0x6e   :  { %v990_v52 = vadd.f32 -0.5, %v434_v46  ;;  %v644_v47 = vsel %vm628_vm3, %v1600_v32, 0.0  ;;  %v646_v26 = vsel %vm630_vm4, %v1600_v32, 0.0  ;;  %vm504_vm5 = vcmp.eq.s32.totalorder %v1134_v23, %v1630_v54 }
  0x6f   :  { %v1742_v21 = vadd.f32 %v644_v47, %v612_v58  ;;  %vm506_vm6 = vcmp.eq.s32.totalorder %v1137_v24, %v1630_v54  ;;  %v442_v15 = vsub.f32 %v988_v10, %v438_v17  ;;  %v1010_v19 = vtrunc.f32 %v438_v17 }
  0x70   :  { %v440_v31 = vfloor.f32 %v990_v52  ;;  %v1748_v7 = vadd.f32 %v646_v26, %v614_v25  ;;  %v520_v8 = vsel %vm504_vm5, %v1621_v3, 0.0  ;;  %v522_v38 = vsel %vm506_vm6, %v1621_v3, 0.0 }
  0x71   :  { %vm536_vm8 = vcmp.eq.s32.totalorder %v1134_v23, %v1632_v37  ;;  %vm538_vm9 = vcmp.eq.s32.totalorder %v1137_v24, %v1632_v37  ;;  %v1011_v4 = vcvt.f32.s32 %v1010_v19  ;;  %v474_v63 = vsub.f32 1.0, %v442_v15 }
  0x72   :  { %v444_v14 = vsub.f32 %v990_v52, %v440_v31  ;;  %v1014_v13 = vtrunc.f32 %v440_v31  ;;  %v675_v50 = vpack.c.bf16 %v1748_v7, %v1742_v21  ;;  %v552_v10 = vsel %vm536_vm8, %v1623_v61, 0.0 }
  0x73   :  { %v554_v46 = vsel %vm538_vm9, %v1623_v61, 0.0  ;;  %v371_v59 = vstv %s1729_s29  ;;  %v452_v58 = vadd.s32 1, %v1011_v4  ;;  %vm584_vm11 = vcmp.eq.s32.totalorder %v1134_v23, %v1657_v55 }
  0x74   :  { %v1015_v62 = vcvt.f32.s32 %v1014_v13  ;;  %v476_v17 = vsub.f32 1.0, %v444_v14  ;;  %v450_v25 = vand.u32 7, %v1011_v4  ;;  %v1763_v47 = vmul.f32 %v474_v63, %v444_v14 }
  0x75   :  { %v568_v52 = vadd.f32 %v552_v10, %v520_v8  ;;  %v570_v26 = vadd.f32 %v554_v46, %v522_v38  ;;  %v454_v31 = vand.u32 7, %v452_v58  ;;  %vm586_vm14 = vcmp.eq.s32.totalorder %v1137_v24, %v1657_v55 }
  0x76   :  { %v456_v19 = vand.u32 7, %v1015_v62  ;;  %v458_v44 = vadd.s32 1, %v1015_v62  ;;  %v1765_v0 = vmul.f32 %v476_v17, %v474_v63  ;;  %v1767_v53 = vmul.f32 %v476_v17, %v442_v15 }
  0x77   :  { %v600_v13 = vsel %vm584_vm11, %v1610_v22, 0.0  ;;  %vm632_vm13 = vcmp.eq.s32.totalorder %v1134_v23, %v1659_v49  ;;  %v602_v8 = vsel %vm586_vm14, %v1610_v22, 0.0  ;;  %vm634_vm15 = vcmp.eq.s32.totalorder %v1137_v24, %v1659_v49 }
  0x78   :  { %v460_v4 = vand.u32 7, %v458_v44  ;;  %v462_v34 = vmul.u32 8, %v456_v19  ;;  %v616_v38 = vadd.f32 %v600_v13, %v568_v52  ;;  %v618_v10 = vadd.f32 %v602_v8, %v570_v26 }
  0x79   :  { %v648_v63 = vsel %vm632_vm13, %v1600_v32, 0.0  ;;  %vm508_vm0 = vcmp.eq.s32.totalorder %v1151_v35, %v1630_v54  ;;  %v650_v44 = vsel %vm634_vm15, %v1600_v32, 0.0  ;;  %v1785_v17 = vmul.f32 %v444_v14, %v442_v15 }
  0x7a   :  { %v1780_v46 = vadd.s32 %v462_v34, %v450_v25  ;;  %v1782_v62 = vadd.s32 %v462_v34, %v454_v31  ;;  %v468_v58 = vmul.u32 8, %v460_v4  ;;  %v1787_v19 = vadd.f32 %v648_v63, %v616_v38 }
  0x7b   :  { %v1789_v52 = vadd.f32 %v650_v44, %v618_v10  ;;  %v1792_v26 = vsel %vm508_vm0, %v1621_v3, 0.0  ;;  %vm510_vm15 = vcmp.eq.s32.totalorder %v1154_v36, %v1630_v54 }
  0x7c   :  { %v1794_v13 = vadd.s32 %v468_v58, %v450_v25  ;;  %v1796_v8 = vadd.s32 %v468_v58, %v454_v31  ;;  %vm495_vm2 = vcmp.eq.s32.totalorder %v1094_v6, %v1780_v46  ;;  %vm497_vm3 = vcmp.eq.s32.totalorder %v1113_v11, %v1780_v46 }
  0x7d   :  { %v511_v34 = vsel %vm495_vm2, %v1765_v0, 0.0  ;;  %v513_v15 = vsel %vm497_vm3, %v1765_v0, 0.0  ;;  %vm527_vm4 = vcmp.eq.s32.totalorder %v1094_v6, %v1782_v62  ;;  %vm529_vm5 = vcmp.eq.s32.totalorder %v1113_v11, %v1782_v62 }
  0x7e   :  { %v543_v14 = vsel %vm527_vm4, %v1767_v53, 0.0  ;;  %v545_v25 = vsel %vm529_vm5, %v1767_v53, 0.0  ;;  %vm575_vm6 = vcmp.eq.s32.totalorder %v1094_v6, %v1794_v13  ;;  %vm577_vm8 = vcmp.eq.s32.totalorder %v1113_v11, %v1794_v13 }
  0x7f   :  { %v559_v31 = vadd.f32 %v543_v14, %v511_v34  ;;  %v561_v4 = vadd.f32 %v545_v25, %v513_v15  ;;  %v591_v38 = vsel %vm575_vm6, %v1763_v47, 0.0  ;;  %v593_v10 = vsel %vm577_vm8, %v1763_v47, 0.0 }
  0x80   :  { %vm623_vm9 = vcmp.eq.s32.totalorder %v1094_v6, %v1796_v8  ;;  %vm625_vm11 = vcmp.eq.s32.totalorder %v1113_v11, %v1796_v8  ;;  %vm499_vm14 = vcmp.eq.s32.totalorder %v1116_v12, %v1780_v46  ;;  %vm501_vm13 = vcmp.eq.s32.totalorder %v1124_v16, %v1780_v46 }
  0x81   :  { %v607_v63 = vadd.f32 %v591_v38, %v559_v31  ;;  %v609_v58 = vadd.f32 %v593_v10, %v561_v4  ;;  %v639_v44 = vsel %vm623_vm9, %v1785_v17, 0.0  ;;  %v641_v34 = vsel %vm625_vm11, %v1785_v17, 0.0 }
  0x82   :  { %v515_v6 = vsel %vm499_vm14, %v1765_v0, 0.0  ;;  %v517_v15 = vsel %vm501_vm13, %v1765_v0, 0.0  ;;  %vm531_vm0 = vcmp.eq.s32.totalorder %v1116_v12, %v1782_v62  ;;  %vm533_vm2 = vcmp.eq.s32.totalorder %v1124_v16, %v1782_v62 }
  0x83   :  { %v655_v11 = vadd.f32 %v639_v44, %v607_v63  ;;  %v657_v14 = vadd.f32 %v641_v34, %v609_v58  ;;  %v547_v25 = vsel %vm531_vm0, %v1767_v53, 0.0  ;;  %v549_v31 = vsel %vm533_vm2, %v1767_v53, 0.0 }
  0x84   :  { %v563_v4 = vadd.f32 %v547_v25, %v515_v6  ;;  %v565_v38 = vadd.f32 %v549_v31, %v517_v15  ;;  %vm579_vm3 = vcmp.eq.s32.totalorder %v1116_v12, %v1794_v13  ;;  %vm581_vm4 = vcmp.eq.s32.totalorder %v1124_v16, %v1794_v13 }
  0x85   :  { %v672_v10 = vpack.c.bf16 %v657_v14, %v655_v11  ;;  %v595_v51 = vsel %vm579_vm3, %v1763_v47, 0.0  ;;  %v597_v43 = vsel %vm581_vm4, %v1763_v47, 0.0  ;;  %vm627_vm5 = vcmp.eq.s32.totalorder %v1116_v12, %v1796_v8 }
  0x86   :  { %v611_v63 = vadd.f32 %v595_v51, %v563_v4  ;;  %v613_v58 = vadd.f32 %v597_v43, %v565_v38  ;;  %vm629_vm6 = vcmp.eq.s32.totalorder %v1124_v16, %v1796_v8  ;;  %v643_v44 = vsel %vm627_vm5, %v1785_v17, 0.0 }
  0x87   :  { %685 = vmatpush1.bf16.msra.mxu0 %v672_v10  ;;  %v645_v34 = vsel %vm629_vm6, %v1785_v17, 0.0  ;;  %v677_v6 = vpack.c.bf16 %v1789_v52, %v1787_v19  ;;  %vm503_vm8 = vcmp.eq.s32.totalorder %v1134_v23, %v1780_v46  ;;  %vm505_vm9 = vcmp.eq.s32.totalorder %v1137_v24, %v1780_v46 }
  0x88   :  { %686 = vmatprep.subr.bf16.mxu0 %v675_v50  ;;  %v659_v12 = vadd.f32 %v643_v44, %v611_v63  ;;  %v661_v16 = vadd.f32 %v645_v34, %v613_v58  ;;  %v519_v43 = vsel %vm503_vm8, %v1765_v0, 0.0  ;;  %v521_v51 = vsel %vm505_vm9, %v1765_v0, 0.0 }
  0x89   :  { %vm535_vm11 = vcmp.eq.s32.totalorder %v1134_v23, %v1782_v62  ;;  %vm537_vm14 = vcmp.eq.s32.totalorder %v1137_v24, %v1782_v62  ;;  %vm583_vm13 = vcmp.eq.s32.totalorder %v1134_v23, %v1794_v13  ;;  %vm585_vm0 = vcmp.eq.s32.totalorder %v1137_v24, %v1794_v13 }
  0x8a   :  { %v674_v21 = vpack.c.bf16 %v661_v16, %v659_v12  ;;  %v551_v7 = vsel %vm535_vm11, %v1767_v53, 0.0  ;;  %v553_v50 = vsel %vm537_vm14, %v1767_v53, 0.0  ;;  %v599_v19 = vsel %vm583_vm13, %v1763_v47, 0.0 }
  0x8b   :  { %v567_v52 = vadd.f32 %v551_v7, %v519_v43  ;;  %v569_v15 = vadd.f32 %v553_v50, %v521_v51  ;;  %v601_v11 = vsel %vm585_vm0, %v1763_v47, 0.0  ;;  %vm631_vm2 = vcmp.eq.s32.totalorder %v1134_v23, %v1796_v8 }
  0x8c   :  { %687 = vmatpush1.bf16.msra.mxu0 %v674_v21  ;;  %vm633_vm3 = vcmp.eq.s32.totalorder %v1137_v24, %v1796_v8  ;;  %v647_v14 = vsel %vm631_vm2, %v1785_v17, 0.0  ;;  %v526_v25 = vsel %vm510_vm15, %v1621_v3, 0.0  ;;  %vm540_vm4 = vcmp.eq.s32.totalorder %v1151_v35, %v1632_v37 }
  0x8d   :  { %688 = vmatprep.subr.bf16.mxu0 %v677_v6  ;;  %v615_v31 = vadd.f32 %v599_v19, %v567_v52  ;;  %v617_v4 = vadd.f32 %v601_v11, %v569_v15  ;;  %v649_v38 = vsel %vm633_vm3, %v1785_v17, 0.0  ;;  %vm542_vm5 = vcmp.eq.s32.totalorder %v1154_v36, %v1632_v37 }
  0x8e   :  { %v556_v23 = vsel %vm540_vm4, %v1623_v61, 0.0  ;;  %v558_v24 = vsel %vm542_vm5, %v1623_v61, 0.0  ;;  %vm588_vm6 = vcmp.eq.s32.totalorder %v1151_v35, %v1657_v55  ;;  %vm590_vm15 = vcmp.eq.s32.totalorder %v1154_v36, %v1657_v55 }
  0x8f   :  { %v663_v3 = vadd.f32 %v647_v14, %v615_v31  ;;  %v665_v54 = vadd.f32 %v649_v38, %v617_v4  ;;  %v572_v10 = vadd.f32 %v556_v23, %v1792_v26  ;;  %v574_v63 = vadd.f32 %v558_v24, %v526_v25 }
  0x90   :  { %v604_v58 = vsel %vm588_vm6, %v1610_v22, 0.0  ;;  %v606_v44 = vsel %vm590_vm15, %v1610_v22, 0.0  ;;  %vm636_vm8 = vcmp.eq.s32.totalorder %v1151_v35, %v1659_v49  ;;  %vm638_vm9 = vcmp.eq.s32.totalorder %v1154_v36, %v1659_v49 }
  0x91   :  { %v676_v61 = vpack.c.bf16 %v665_v54, %v663_v3  ;;  %v620_v37 = vadd.f32 %v604_v58, %v572_v10  ;;  %v622_v55 = vadd.f32 %v606_v44, %v574_v63  ;;  %v652_v26 = vsel %vm636_vm8, %v1600_v32, 0.0 }
  0x92   :  { %v654_v34 = vsel %vm638_vm9, %v1600_v32, 0.0  ;;  %vm507_vm11 = vcmp.eq.s32.totalorder %v1151_v35, %v1780_v46  ;;  %vm509_vm14 = vcmp.eq.s32.totalorder %v1154_v36, %v1780_v46  ;;  %vm539_vm13 = vcmp.eq.s32.totalorder %v1151_v35, %v1782_v62 }
  0x93   :  { %689 = vmatpush1.bf16.msra.mxu0 %v676_v61  ;;  %v668_v22 = vadd.f32 %v652_v26, %v620_v37  ;;  %v670_v49 = vadd.f32 %v654_v34, %v622_v55  ;;  %v523_v6 = vsel %vm507_vm11, %v1765_v0, 0.0  ;;  %v525_v32 = vsel %vm509_vm14, %v1765_v0, 0.0  ;;  %v671_v61 = vld [vmem:[%s2199_s1] sm:$0xf]  ;;  %s2039_s1 = sld [smem:[#allocation2 + $0x38]] }
  0x94   :  { %vm541_vm0 = vcmp.eq.s32.totalorder %v1154_v36, %v1782_v62  ;;  %v555_v46 = vsel %vm539_vm13, %v1767_v53, 0.0  ;;  %vm587_vm2 = vcmp.eq.s32.totalorder %v1151_v35, %v1794_v13  ;;  %vm589_vm3 = vcmp.eq.s32.totalorder %v1154_v36, %v1794_v13 }
  0x95   :  { %v679_v0 = vpack.c.bf16 %v670_v49, %v668_v22  ;;  %v557_v12 = vsel %vm541_vm0, %v1767_v53, 0.0  ;;  %v571_v16 = vadd.f32 %v555_v46, %v523_v6  ;;  %v603_v62 = vsel %vm587_vm2, %v1763_v47, 0.0 }
  0x96   :  { %v573_v43 = vadd.f32 %v557_v12, %v525_v32  ;;  %v605_v51 = vsel %vm589_vm3, %v1763_v47, 0.0  ;;  %vm635_vm4 = vcmp.eq.s32.totalorder %v1151_v35, %v1796_v8  ;;  %vm637_vm5 = vcmp.eq.s32.totalorder %v1154_v36, %v1796_v8 }
  0x97   :  { %690 = vmatprep.subr.bf16.mxu0 %v679_v0  ;;  %v619_v13 = vadd.f32 %v603_v62, %v571_v16  ;;  %v651_v21 = vsel %vm635_vm4, %v1785_v17, 0.0  ;;  %v653_v53 = vsel %vm637_vm5, %v1785_v17, 0.0  ;;  %v236_v7 = vsel %vm1400_vm1, %v1581_v48, 0.0 }
  0x98   :  { %v621_v47 = vadd.f32 %v605_v51, %v573_v43  ;;  %v372_v35 = vmul.f32 %v371_v59, %v1616_v41  ;;  %v375_v50 = vstv %s1898_s4  ;;  %v381_v36 = vstv %s1900_s5 }
  0x99   :  { %v667_v8 = vadd.f32 %v651_v21, %v619_v13  ;;  %v376_v19 = vmul.f32 %v375_v50, %v1619_v28  ;;  %v382_v52 = vmul.f32 %v381_v36, %v1626_v45  ;;  %v387_v15 = vstv %s1903_s6 }
  0x9a   :  { %v669_v17 = vadd.f32 %v653_v53, %v621_v47  ;;  %v388_v11 = vmul.f32 %v387_v15, %v1616_v41  ;;  %v391_v14 = vstv %s1912_s7  ;;  %v397_v48 = vstv %s1914_s8 }
  0x9b   :  { %v378_v25 = vadd.f32 %v376_v19, %v372_v35  ;;  %v392_v31 = vmul.f32 %v391_v14, %v1619_v28  ;;  %v398_v4 = vmul.f32 %v397_v48, %v1626_v45  ;;  %v403_v38 = vstv %s1918_s9 }
  0x9c   :  { %v678_v23 = vpack.c.bf16 %v669_v17, %v667_v8  ;;  %v404_v24 = vmul.f32 %v403_v38, %v1616_v41  ;;  %v407_v3 = vstv %s1927_s10  ;;  %v413_v54 = vstv %s1929_s11 }
  0x9d   :  { %v384_v10 = vadd.f32 %v382_v52, %v378_v25  ;;  %v394_v63 = vadd.f32 %v392_v31, %v388_v11  ;;  %v408_v58 = vmul.f32 %v407_v3, %v1619_v28  ;;  %v414_v44 = vmul.f32 %v413_v54, %v1626_v45 }
  0x9e   :  { %691 = vmatpush1.bf16.msra.mxu0 %v678_v23  ;;  %vm680_vm6 = vcmask 523264   ;;  %v238_v41 = vsel %vm1400_vm1, %v1598_v1, 0.0  ;;  %v240_v45 = vsel %vm1400_vm1, %v1628_v18, 0.0  ;;  %v2238_v22 = vstv %s1362_s22 }
  0x9f   :  { %v400_v37 = vadd.f32 %v398_v4, %v394_v63  ;;  %v410_v55 = vadd.f32 %v408_v58, %v404_v24  ;;  %v1970_v28 = vsel %vm1691_vm10, %v384_v10, %v236_v7  ;;  %v183_v49 = vmul.f32 %v2238_v22, %v1423_v27 }
  0xa0   :  { %v2239_v6 = vstv %s1364_s23  ;;  %v2240_v18 = vstv %s1433_s25  ;;  %v2241_v0 = vstv %s1456_s26  ;;  %v373_v16 = vmul.f32 %v371_v59, %v1465_v39 }
  0xa1   :  { %992 = vmatmul.mubr.msk.bf16.vlgmr.msra.gmra.mrb[0].mxu0 %vm680_vm6, %v671_v61  ;;  %v416_v26 = vadd.f32 %v414_v44, %v410_v55  ;;  %v1977_v34 = vsel %vm1691_vm10, %v400_v37, %v238_v41  ;;  %v187_v32 = vmul.f32 %v2239_v6, %v1426_v40  ;;  %v199_v46 = vmul.f32 %v2240_v18, %v1423_v27 }
  0xa2   :  { %v203_v12 = vmul.f32 %v2241_v0, %v1426_v40  ;;  %v377_v62 = vmul.f32 %v375_v50, %v1468_v29  ;;  %v389_v43 = vmul.f32 %v387_v15, %v1465_v39  ;;  %v393_v51 = vmul.f32 %v391_v14, %v1468_v29 }
  0xa3   :  { %v1981_v1 = vsel %vm1691_vm10, %v416_v26, %v240_v45  ;;  %v189_v13 = vadd.f32 %v187_v32, %v183_v49  ;;  %v2242_v21 = vstv %s1420_s24  ;;  %v2243_v47 = vstv %s1501_s27 }
  0xa4   :  { %v193_v53 = vmul.f32 %v2242_v21, %v1429_v33  ;;  %v205_v7 = vadd.f32 %v203_v12, %v199_v46  ;;  %v209_v35 = vmul.f32 %v2243_v47, %v1429_v33  ;;  %v2244_v8 = vstv %s1504_s30 }
  0xa5   :  { %v215_v19 = vmul.f32 %v2244_v8, %v1423_v27  ;;  %v2245_v52 = vstv %s1529_s3  ;;  %v379_v17 = vadd.f32 %v377_v62, %v373_v16  ;;  %v383_v50 = vmul.f32 %v381_v36, %v1471_v20 }
  0xa6   :  { %v219_v59 = vmul.f32 %v2245_v52, %v1426_v40  ;;  %v195_v15 = vadd.f32 %v193_v53, %v189_v13  ;;  %v211_v11 = vadd.f32 %v209_v35, %v205_v7  ;;  %v2246_v14 = vstv %s1551_s28 }
  0xa7   :  { %v225_v25 = vmul.f32 %v2246_v14, %v1429_v33  ;;  %v395_v31 = vadd.f32 %v393_v51, %v389_v43  ;;  %v385_v23 = vadd.f32 %v383_v50, %v379_v17  ;;  %v399_v24 = vmul.f32 %v397_v48, %v1471_v20 }
  0xa8   :  { %v221_v4 = vadd.f32 %v219_v59, %v215_v19  ;;  %v405_v10 = vmul.f32 %v403_v38, %v1465_v39  ;;  %v237_v27 = vsel %vm1355_vm12, %v195_v15, 0.0  ;;  %v239_v40 = vsel %vm1355_vm12, %v211_v11, 0.0 }
  0xa9   :  { %v409_v36 = vmul.f32 %v407_v3, %v1468_v29  ;;  %v415_v63 = vmul.f32 %v413_v54, %v1471_v20  ;;  %v401_v44 = vadd.f32 %v399_v24, %v395_v31  ;;  %v425_v33 = vsel %vm1512_vm7, %v385_v23, %v237_v27 }
  0xaa   :  { %v227_v58 = vadd.f32 %v225_v25, %v221_v4  ;;  %v729_v48 = vmul.f32 %v1970_v28, %v1970_v28  ;;  %v731_v39 = vmul.f32 %v1977_v34, %v1977_v34  ;;  %v730_v61 = vmul.f32 %v425_v33, %v425_v33 }
  0xab   :  { %v411_v38 = vadd.f32 %v409_v36, %v405_v10  ;;  %v427_v29 = vsel %vm1512_vm7, %v401_v44, %v239_v40  ;;  %v735_v3 = vmul.f32 %v1981_v1, %v1981_v1  ;;  %v750_v12 = vstv %s2039_s1 }
  0xac   :  { %v241_v41 = vsel %vm1355_vm12, %v227_v58, 0.0  ;;  %v733_v20 = vadd.f32 %v731_v39, %v729_v48  ;;  %v732_v37 = vmul.f32 %v427_v29, %v427_v29  ;;  %v754_v16 = vstv %s2041_s14 }
  0xad   :  { %v417_v54 = vadd.f32 %v415_v63, %v411_v38  ;;  %v766_v21 = vstv %s2043_s15  ;;  %v760_v53 = vstv %s2047_s16  ;;  %v770_v7 = vstv %s2045_s0 }
  0xae   :  { %v737_v55 = vadd.f32 %v735_v3, %v733_v20  ;;  %v734_v26 = vadd.f32 %v732_v37, %v730_v61  ;;  %v782_v52 = vstv %s2051_s18  ;;  %v792_v59 = vstv %s2055_s20 }
  0xaf   :  { %v429_v45 = vsel %vm1512_vm7, %v417_v54, %v241_v41  ;;  %vm899_vm15 = vcmask 1044480   ;;  %vm902_vm8 = vcmask 1045504   ;;  %vm905_vm9 = vcmask 1046528  }
  0xb0   :  { %v736_v22 = vmul.f32 %v429_v45, %v429_v45  ;;  %v739_v49 = vmax.f32 %v737_v55, 1e-24 }
  0xb2   :  { %v738_v6 = vadd.f32 %v736_v22, %v734_v26  ;;  %1029 = vrsqrt.f32 %v739_v49 }
  0xb4   :  { %v740_v32 = vmax.f32 %v738_v6, 1e-24 }
  0xb6   :  { %1031 = vrsqrt.f32 %v740_v32 }
  0xbc   :  { %v1030_v18 = vpop.eup %1029 }
  0xbd   :  { %v2058_v46 = vmul.f32 %v1030_v18, %v1970_v28  ;;  %v2061_v0 = vmul.f32 %v1030_v18, %v1977_v34  ;;  %v2066_v43 = vmul.f32 %v1030_v18, %v1981_v1  ;;  %v776_v34 = vstv %s2049_s17 }
  0xbe   :  { %v786_v1 = vstv %s2053_s19 }
  0xbf   :  { %v751_v51 = vmul.f32 %v750_v12, %v2058_v46  ;;  %v755_v13 = vmul.f32 %v754_v16, %v2061_v0  ;;  %v767_v28 = vmul.f32 %v766_v21, %v2058_v46  ;;  %v761_v35 = vmul.f32 %v760_v53, %v2066_v43 }
  0xc0   :  { %v1032_v62 = vpop.eup %1031  ;;  %v771_v8 = vmul.f32 %v770_v7, %v2061_v0  ;;  %v777_v19 = vmul.f32 %v776_v34, %v2066_v43  ;;  %v783_v11 = vmul.f32 %v782_v52, %v2058_v46  ;;  %v787_v14 = vmul.f32 %v786_v1, %v2061_v0 }
  0xc1   :  { %v757_v47 = vadd.f32 %v755_v13, %v751_v51  ;;  %v2081_v17 = vmul.f32 %v1032_v62, %v425_v33  ;;  %v793_v25 = vmul.f32 %v792_v59, %v2066_v43  ;;  %v2086_v31 = vmul.f32 %v1032_v62, %v427_v29 }
  0xc2   :  { %v773_v15 = vadd.f32 %v771_v8, %v767_v28  ;;  %v2088_v4 = vmul.f32 %v1032_v62, %v429_v45  ;;  %v789_v10 = vadd.f32 %v787_v14, %v783_v11  ;;  %v1061_v62 = vmov 0.0  }
  0xc3   :  { %v763_v50 = vadd.f32 %v761_v35, %v757_v47  ;;  %v752_v23 = vmul.f32 %v750_v12, %v2081_v17  ;;  %v768_v40 = vmul.f32 %v766_v21, %v2081_v17  ;;  %v756_v36 = vmul.f32 %v754_v16, %v2086_v31 }
  0xc4   :  { %v779_v24 = vadd.f32 %v777_v19, %v773_v15  ;;  %v762_v63 = vmul.f32 %v760_v53, %v2088_v4  ;;  %v772_v58 = vmul.f32 %v770_v7, %v2086_v31  ;;  %v778_v44 = vmul.f32 %v776_v34, %v2088_v4 }
  0xc5   :  { %v797_v27 = vmul.f32 %v763_v50, %v763_v50  ;;  %v795_v33 = vadd.f32 %v793_v25, %v789_v10  ;;  %v784_v39 = vmul.f32 %v782_v52, %v2081_v17  ;;  %v788_v38 = vmul.f32 %v786_v1, %v2086_v31 }
  0xc6   :  { %v799_v48 = vmul.f32 %v779_v24, %v779_v24  ;;  %v758_v61 = vadd.f32 %v756_v36, %v752_v23  ;;  %v774_v41 = vadd.f32 %v772_v58, %v768_v40  ;;  %v794_v29 = vmul.f32 %v792_v59, %v2088_v4 }
  0xc7   :  { %v803_v3 = vmul.f32 %v795_v33, %v795_v33  ;;  %v790_v54 = vadd.f32 %v788_v38, %v784_v39  ;;  %v230_v51 = vsel %vm1400_vm1, 1.0, %v1061_v62  ;;  %v231_v21 = vsel %vm1355_vm12, 1.0, %v1061_v62 }
  0xc8   :  { %v801_v20 = vadd.f32 %v799_v48, %v797_v27  ;;  %v764_v37 = vadd.f32 %v762_v63, %v758_v61  ;;  %v780_v55 = vadd.f32 %v778_v44, %v774_v41  ;;  %v418_v13 = vsel %vm1691_vm10, 1.0, %v230_v51 }
  0xc9   :  { %v796_v26 = vadd.f32 %v794_v29, %v790_v54  ;;  %v725_v28 = vmax.f32 %v418_v13, 0.0  ;;  %v419_v35 = vsel %vm1512_vm7, 1.0, %v231_v21  ;;  %vm908_vm12 = vcmask 1040384  }
  0xca   :  { %v805_v45 = vadd.f32 %v803_v3, %v801_v20  ;;  %v798_v22 = vmul.f32 %v764_v37, %v764_v37  ;;  %v800_v49 = vmul.f32 %v780_v55, %v780_v55  ;;  %v726_v1 = vmax.f32 %v419_v35, 0.0 }
  0xcb   :  { %v804_v32 = vmul.f32 %v796_v26, %v796_v26  ;;  %v2107_v59 = vmin.f32 %v725_v28, 1.0  ;;  %vm911_vm1 = vcmask 1041408   ;;  %vm893_vm7 = vcmask 1042432  }
  0xcc   :  { %v807_v6 = vmax.f32 %v805_v45, 1e-24  ;;  %v802_v18 = vadd.f32 %v800_v49, %v798_v22  ;;  %v2116_v36 = vmin.f32 %v726_v1, 1.0  ;;  %vm896_vm10 = vcmask 1043456  }
  0xcd   :  { %v2112_v2 = vsub.f32 1.0, %v2107_v59  ;;  %v843_v41 = vmul.f32 %v2061_v0, %v2107_v59 }
  0xce   :  { %1033 = vrsqrt.f32 %v807_v6  ;;  %v806_v12 = vadd.f32 %v804_v32, %v802_v18  ;;  %v2126_v20 = vsub.f32 1.0, %v2116_v36  ;;  %v838_v6 = vmul.f32 %v2081_v17, %v2116_v36 }
  0xcf   :  { %v839_v48 = vmul.f32 0.0, %v2112_v2 }
  0xd0   :  { %v808_v16 = vmax.f32 %v806_v12, 1e-24  ;;  %v840_v12 = vmul.f32 0.0, %v2126_v20 }
  0xd2   :  { %1035 = vrsqrt.f32 %v808_v16  ;;  %v844_v16 = vmul.f32 %v2086_v31, %v2116_v36  ;;  %v842_v17 = vadd.f32 %v840_v12, %v838_v6 }
  0xd8   :  { %v1034_v53 = vpop.eup %1033 }
  0xd9   :  { %v811_v7 = vmul.f32 %v1034_v53, %v763_v50  ;;  %v813_v34 = vmul.f32 %v1034_v53, %v779_v24  ;;  %v815_v47 = vmul.f32 %v1034_v53, %v795_v33  ;;  %v837_v33 = vmul.f32 %v2058_v46, %v2107_v59 }
  0xda   :  { %v2132_v46 = vadd.f32 %v843_v41, %v839_v48  ;;  %v846_v53 = vadd.f32 %v844_v16, %v840_v12  ;;  %v848_v41 = vmul.f32 %v2088_v4, %v2116_v36 }
  0xdb   :  { %v865_v8 = vadd.f32 1.0, %v813_v34  ;;  %v879_v19 = vadd.f32 1.0, %v815_v47  ;;  %v851_v52 = vadd.f32 1.0, %v811_v7  ;;  %v817_v61 = vand.u32 2147483647, %v815_v47 }
  0xdc   :  { %v1036_v60 = vpop.eup %1035  ;;  %v2128_v3 = vadd.f32 %v839_v48, %v837_v33 }
  0xdd   :  { %v867_v56 = vmul.f32 0.5, %v865_v8  ;;  %v881_v15 = vmul.f32 0.5, %v879_v19  ;;  %v853_v11 = vmul.f32 0.5, %v851_v52  ;;  %v812_v42 = vmul.f32 %v1036_v60, %v764_v37 }
  0xde   :  { %v814_v14 = vmul.f32 %v1036_v60, %v780_v55  ;;  %v2109_v25 = vmul.f32 %v1036_v60, %v796_v26 }
  0xdf   :  { %v1006_v50 = vadd.f32 -0.5, %v867_v56  ;;  %v1008_v23 = vadd.f32 -1.0, %v881_v15  ;;  %v1004_v24 = vadd.f32 -0.5, %v853_v11  ;;  %v852_v40 = vadd.f32 1.0, %v812_v42 }
  0xe0   :  { %v866_v58 = vadd.f32 1.0, %v814_v14  ;;  %v880_v44 = vadd.f32 1.0, %v2109_v25  ;;  %v818_v1 = vand.u32 2147483647, %v2109_v25 }
  0xe1   :  { %v871_v10 = vmul.f32 %v1006_v50, %v2107_v59  ;;  %v885_v27 = vmul.f32 %v1008_v23, %v2107_v59  ;;  %v857_v63 = vmul.f32 %v1004_v24, %v2107_v59  ;;  %v854_v55 = vmul.f32 0.5, %v852_v40 }
  0xe2   :  { %v868_v26 = vmul.f32 0.5, %v866_v58  ;;  %v882_v22 = vmul.f32 0.5, %v880_v44 }
  0xe3   :  { %v873_v39 = vadd.f32 0.5, %v871_v10  ;;  %v887_v38 = vadd.f32 1.0, %v885_v27  ;;  %v859_v29 = vadd.f32 0.5, %v857_v63  ;;  %v1005_v51 = vadd.f32 -0.5, %v854_v55 }
  0xe4   :  { %v1007_v13 = vadd.f32 -0.5, %v868_v26  ;;  %v1009_v28 = vadd.f32 -1.0, %v882_v22 }
  0xe5   :  { %v875_v54 = vmul.f32 %v873_v39, %v2107_v59  ;;  %v889_v37 = vmul.f32 %v887_v38, %v2107_v59  ;;  %v861_v45 = vmul.f32 %v859_v29, %v2107_v59  ;;  %v858_v34 = vmul.f32 %v1005_v51, %v2116_v36 }
  0xe6   :  { %v872_v47 = vmul.f32 %v1007_v13, %v2116_v36  ;;  %v886_v35 = vmul.f32 %v1009_v28, %v2116_v36  ;;  %v847_v39 = vmul.f32 %v2066_v43, %v2107_v59  ;;  %v850_v43 = vadd.f32 %v848_v41, %v2126_v20 }
  0xe7   :  { %v877_v49 = vadd.f32 %v875_v54, %v839_v48  ;;  %v891_v0 = vadd.f32 %v889_v37, %v2112_v2  ;;  %v2138_v32 = vadd.f32 %v861_v45, %v839_v48 }
  0xe8   :  { %v874_v8 = vadd.f32 0.5, %v872_v47  ;;  %v888_v19 = vadd.f32 1.0, %v886_v35  ;;  %v849_v37 = vadd.f32 %v847_v39, %v2112_v2 }
  0xe9   :  { %v909_v18 = vsel %vm908_vm12, %v877_v49, %v891_v0 }
  0xea   :  { %v912_v62 = vsel %vm911_vm1, %v909_v18, %v817_v61  ;;  %v876_v60 = vmul.f32 %v874_v8, %v2116_v36 }
  0xeb   :  { %v914_v21 = vsel %vm893_vm7, %v912_v62, %v1710_v57  ;;  %v860_v57 = vadd.f32 0.5, %v858_v34 }
  0xec   :  { %v916_v7 = vsel %vm896_vm10, %v914_v21, %v1725_v5  ;;  %v890_v5 = vmul.f32 %v888_v19, %v2116_v36  ;;  %v878_v15 = vadd.f32 %v876_v60, %v840_v12 }
  0xed   :  { %v918_v31 = vsel %vm899_vm15, %v916_v7, 0.0  ;;  %v862_v52 = vmul.f32 %v860_v57, %v2116_v36 }
  0xee   :  { %922 = vst [vmem:[%s2200_s2 + $0x10] sm:$0xff] %v918_v31  ;;  %v892_v11 = vadd.f32 %v890_v5, %v2126_v20 }
  0xef   :  { %v864_v56 = vadd.f32 %v862_v52, %v840_v12 }
  0xf0   :  { %v910_v42 = vsel %vm908_vm12, %v878_v15, %v892_v11 }
  0xf1   :  { %v913_v14 = vsel %vm911_vm1, %v910_v42, %v818_v1 }
  0xf2   :  { %v915_v50 = vsel %vm893_vm7, %v913_v14, %v1533_v30 }
  0xf3   :  { %v917_v23 = vsel %vm896_vm10, %v915_v50, %v1543_v9 }
  0xf4   :  { %v919_v24 = vsel %vm899_vm15, %v917_v23, 0.0 }
  0xf5   :  { %923 = vst [vmem:[%s2200_s2 + $0x18] sm:$0xff] %v919_v24 }
 0x174   :  { %v718_v25 = vpop.f32.mrb[0].mxu0 }
 0x175   :  { %v1002_v10 = vmul.f32 -1.442695, %v718_v25  ;;  %v720_v27 = vpop.f32.mrb[1].mxu0 }
 0x176   :  { %v1003_v40 = vmul.f32 -1.442695, %v720_v27  ;;  %v722_v63 = vpop.f32.mrb[2].mxu0 }
 0x177   :  { %1037 = vpow2.f32 %v1002_v10  ;;  %v723_v58 = vpop.f32.mrb[3].mxu0 }
 0x178   :  { %1039 = vpow2.f32 %v1003_v40 }
 0x181   :  { %v1038_v44 = vpop.eup %1037 }
 0x182   :  { %v1040_v33 = vpop.eup %1039  ;;  %v825_v30 = vadd.f32 1.0, %v1038_v44 }
 0x183   :  { %v826_v48 = vadd.f32 1.0, %v1040_v33 }
 0x184   :  { %1041 = vrcp.f32 %v825_v30 }
 0x185   :  { %1043 = vrcp.f32 %v826_v48 }
 0x18e   :  { %v1042_v9 = vpop.eup %1041 }
 0x18f   :  { %v1044_v38 = vpop.eup %1043  ;;  %v831_v61 = vmul.f32 %v1042_v9, %v2107_v59 }
 0x190   :  { %v832_v29 = vmul.f32 %v1044_v38, %v2116_v36 }
 0x191   :  { %v835_v54 = vadd.f32 %v2112_v2, %v831_v61 }
 0x192   :  { %v836_v55 = vadd.f32 %v2126_v20, %v832_v29 }
 0x193   :  { %v894_v45 = vsel %vm893_vm7, %v835_v54, %v2107_v59 }
 0x194   :  { %v897_v26 = vsel %vm896_vm10, %v894_v45, %v2128_v3  ;;  %v895_v4 = vsel %vm893_vm7, %v836_v55, %v2116_v36 }
 0x195   :  { %v900_v22 = vsel %vm899_vm15, %v897_v26, %v2132_v46  ;;  %v898_v2 = vsel %vm896_vm10, %v895_v4, %v842_v17 }
 0x196   :  { %v903_v49 = vsel %vm902_vm8, %v900_v22, %v849_v37  ;;  %v901_v0 = vsel %vm899_vm15, %v898_v2, %v846_v53 }
 0x197   :  { %v906_v59 = vsel %vm905_vm9, %v903_v49, %v2138_v32  ;;  %v904_v6 = vsel %vm902_vm8, %v901_v0, %v850_v43 }
 0x198   :  { %920 = vst [vmem:[%s2200_s2] sm:$0xff] %v906_v59  ;;  %v907_v20 = vsel %vm905_vm9, %v904_v6, %v864_v56 }
 0x199   :  { %921 = vst [vmem:[%s2200_s2 + $0x8] sm:$0xff] %v907_v20 }
 0x19a   :  { %928 = vsyncpa [#allocation3], 1 }

</bundles_post_ra>
